<compile_context>
chip_gen: v7x
topology: tpu7x:2x2x1
jax: 0.10.0
libtpu: 0.0.40
codegen_flags: <defaults>
</compile_context>

<pallas_src>
import functools

import jax
import jax.numpy as jnp
from jax import lax
from jax.experimental import pallas as pl
from jax.experimental.pallas import tpu as pltpu

EPS = 1e-5
MXU_DTYPE = jnp.bfloat16       # MXU operand dtype (f32 accumulation)
ACT_DTYPE = jnp.bfloat16       # inter-pass activation storage dtype
IM2COL_MIN_DEPTH = 128         # im2col K-boost only when per-tap depth < this
                               # TODO(synk): raise to 256 on v6e/v7x (256-deep MXU).


def _vmem_limit_bytes():
    """Per-generation VMEM cap: ~75% of physical, bounded to stay conservative."""
    try:
        cap = int(pltpu.get_tpu_info().vmem_capacity_bytes)
    except Exception:
        cap = 64 << 20
    return int(min(int(cap * 0.75), 96 << 20))


# ----------------------------- in-kernel helpers -----------------------------
def _bn_scale_bias(stats_ref, gamma_ref, beta_ref, inv_count):
    """Fold training-mode BN (batch stats, biased var) into scale/bias (f32)."""
    mean = stats_ref[0:1, :] * inv_count
    var = jnp.maximum(stats_ref[1:2, :] * inv_count - mean * mean, 0.0)
    scale = gamma_ref[...] * lax.rsqrt(var + EPS)       # EUP rsqrt
    bias = beta_ref[...] - mean * scale
    return scale, bias


def _store_stats(s_ref, y):
    """Per-image partial BN statistics (sum, sum of squares) in f32."""
    s_ref[0:1, :] = jnp.sum(y, axis=0, keepdims=True)
    s_ref[1:2, :] = jnp.sum(y * y, axis=0, keepdims=True)


def _zero_halo(pad_ref, Hp, Wp, C):
    """Zero only the 1-wide halo border of a (Hp, Wp, C) padded scratch."""
    dt = pad_ref.dtype
    pad_ref[0:1, :, :] = jnp.zeros((1, Wp, C), dt)
    pad_ref[Hp - 1:Hp, :, :] = jnp.zeros((1, Wp, C), dt)
    pad_ref[:, 0:1, :] = jnp.zeros((Hp, 1, C), dt)
    pad_ref[:, Wp - 1:Wp, :] = jnp.zeros((Hp, 1, C), dt)


def _conv3x3(pad_ref, col_ref, w_ref, Ho, Wo, Ci, stride):
    """3x3 conv from a zero-padded (Hp, Wp, Ci) VMEM ref.

    col_ref is not None  -> build a bf16 (Ho*Wo, 9*Ci) im2col matrix once and
                            do ONE MXU matmul (9x deeper contraction; shallow
                            stages where Ci < MXU depth).
    col_ref is None      -> 9 accumulating per-tap matmuls (deep stages; K per
                            tap already saturates the MXU, skips the col
                            write/read round trip; free on v7x's MRB).
    """
    def tap(kh, kw):
        if stride == 1:
            p = pad_ref[pl.ds(kh, Ho), pl.ds(kw, Wo), :]
        else:
            # TODO(synk): stage parity-decimated buffers once instead of 9
            # strided reads (downsampling blocks only).
            p = pad_ref[pl.ds(kh, Ho, stride), pl.ds(kw, Wo, stride), :]
        return p.reshape(Ho * Wo, Ci).astype(MXU_DTYPE)

    if col_ref is not None:
        for kh in range(3):
            for kw in range(3):
                t = kh * 3 + kw
                col_ref[:, t * Ci:(t + 1) * Ci] = tap(kh, kw)
        return jnp.dot(col_ref[...], w_ref[...],
                       preferred_element_type=jnp.float32)

    acc = None
    for kh in range(3):
        for kw in range(3):
            t = kh * 3 + kw
            part = jnp.dot(tap(kh, kw), w_ref[pl.ds(t * Ci, Ci), :],
                           preferred_element_type=jnp.float32)
            acc = part if acc is None else acc + part
    return acc


# --------------------------------- kernels ------------------------------------
def _make_conv1_kernel(H, W, Ci, P, Ho, Wo, stride, use_proj, use_col):
    Hp, Wp = H + 2, W + 2

    def kernel(*refs):
        it = iter(refs)
        x_ref = next(it)
        w_ref = next(it)
        y1_ref = next(it)
        s1_ref = next(it)
        ysc_ref = next(it) if use_proj else None
        ssc_ref = next(it) if use_proj else None
        xpad_ref = next(it)
        col_ref = next(it) if use_col else None

        # Pad in VMEM: zero only the halo border, overwrite the interior.
        # (Halo zeroing is repeated each step on purpose: doing it only on
        #  program_id==0 is unsafe under megacore grid sharding.)
        _zero_halo(xpad_ref, Hp, Wp, Ci)
        xpad_ref[1:H + 1, 1:W + 1, :] = x_ref[...].astype(xpad_ref.dtype)

        # conv1 (+ folded 1x1 projection columns) + fused one-pass BN stats.
        y = _conv3x3(xpad_ref, col_ref, w_ref, Ho, Wo, Ci, stride)
        y1 = y[:, :P]
        y1_ref[...] = y1.astype(y1_ref.dtype)
        _store_stats(s1_ref, y1)
        if use_proj:
            ysc = y[:, P:]
            ysc_ref[...] = ysc.astype(ysc_ref.dtype)
            _store_stats(ssc_ref, ysc)

    return kernel


def _make_conv2_kernel(P, Ho, Wo, inv_count, use_col):
    Hp, Wp = Ho + 2, Wo + 2

    def kernel(*refs):
        it = iter(refs)
        y1_ref = next(it)
        s1_ref = next(it)
        g1_ref = next(it)
        b1_ref = next(it)
        w2_ref = next(it)
        y2_ref = next(it)
        s2_ref = next(it)
        opad_ref = next(it)
        col_ref = next(it) if use_col else None

        # bn1 (global batch stats folded to scale/bias) + relu, in f32.
        scale, bias = _bn_scale_bias(s1_ref, g1_ref, b1_ref, inv_count)
        out1 = jnp.maximum(y1_ref[...].astype(jnp.float32) * scale + bias, 0.0)

        # re-pad in bf16 VMEM scratch: zero halo, write interior once.
        _zero_halo(opad_ref, Hp, Wp, P)
        opad_ref[1:Ho + 1, 1:Wo + 1, :] = (
            out1.astype(opad_ref.dtype).reshape(Ho, Wo, P))

        # conv2 + fused one-pass BN2 statistics.
        y2 = _conv3x3(opad_ref, col_ref, w2_ref, Ho, Wo, P, 1)
        y2_ref[...] = y2.astype(y2_ref.dtype)
        _store_stats(s2_ref, y2)

    return kernel


def _make_merge_kernel(use_proj, inv_count):
    def kernel(*refs):
        it = iter(refs)
        y2_ref = next(it)
        s2_ref = next(it)
        g2_ref = next(it)
        b2_ref = next(it)
        sc_ref = next(it)
        if use_proj:
            ssc_ref = next(it)
            gs_ref = next(it)
            bs_ref = next(it)
        out_ref = next(it)

        scale2, bias2 = _bn_scale_bias(s2_ref, g2_ref, b2_ref, inv_count)
        out = y2_ref[...].astype(jnp.float32) * scale2 + bias2
        if use_proj:
            ssc, bsc = _bn_scale_bias(ssc_ref, gs_ref, bs_ref, inv_count)
            out = out + sc_ref[...].astype(jnp.float32) * ssc + bsc
        else:
            out = out + sc_ref[...].astype(jnp.float32)   # identity shortcut
        out_ref[...] = jnp.maximum(out, 0.0)

    return kernel


# --------------------------------- wrapper ------------------------------------
def _row_tile(rows):
    # TODO(synk): switch to pl.cdiv + padded tail instead of exact divisors.
    for t in (1024, 512, 256, 128, 64, 32, 16, 8):
        if rows % t == 0:
            return t
    return rows                    # tiny case: one full block (== array dims)


def basic_block_nhwc(x, params, stride):
    """BasicBlock forward on NHWC f32 input; returns NHWC f32."""
    f32 = jnp.float32
    N, H, W, Ci = x.shape
    P = params["w1"].shape[-1]
    Ho = (H + 2 - 3) // stride + 1
    Wo = (W + 2 - 3) // stride + 1
    use_proj = (stride != 1) or (Ci != P)
    count = N * Ho * Wo
    inv_count = 1.0 / count
    use_col1 = Ci < IM2COL_MIN_DEPTH
    use_col2 = P < IM2COL_MIN_DEPTH
    # Strided (stride>1) sublane reads of packed bf16 are kept in f32 scratch.
    pad1_dtype = MXU_DTYPE if stride == 1 else f32

    cparams = functools.partial(pltpu.CompilerParams,
                                vmem_limit_bytes=_vmem_limit_bytes())

    # Weights in im2col layout; projection folded into conv1's extra columns.
    w1p = params["w1"].reshape(9 * Ci, P)
    if use_proj:
        ws_embed = jnp.zeros((9 * Ci, P), f32).at[4 * Ci:5 * Ci, :].set(
            params["ws"])
        w1p = jnp.concatenate([w1p, ws_embed], axis=1)         # (9Ci, 2P)
    w1p = w1p.astype(MXU_DTYPE)
    Pout1 = w1p.shape[-1]
    w2p = params["w2"].reshape(9 * P, P).astype(MXU_DTYPE)
    g1 = params["g1"].reshape(1, P).astype(f32)
    b1 = params["b1"].reshape(1, P).astype(f32)
    g2 = params["g2"].reshape(1, P).astype(f32)
    b2 = params["b2"].reshape(1, P).astype(f32)

    # ---------- pass 1: conv1 (+ folded projection) + partial BN stats -------
    k1 = _make_conv1_kernel(H, W, Ci, P, Ho, Wo, stride, use_proj, use_col1)
    out_shapes1 = [jax.ShapeDtypeStruct((N, Ho * Wo, P), ACT_DTYPE),
                   jax.ShapeDtypeStruct((N, 2, P), f32)]
    out_specs1 = [pl.BlockSpec((None, Ho * Wo, P), lambda n: (n, 0, 0)),
                  pl.BlockSpec((None, 2, P), lambda n: (n, 0, 0))]
    if use_proj:
        out_shapes1 += [jax.ShapeDtypeStruct((N, Ho * Wo, P), ACT_DTYPE),
                        jax.ShapeDtypeStruct((N, 2, P), f32)]
        out_specs1 += [pl.BlockSpec((None, Ho * Wo, P), lambda n: (n, 0, 0)),
                       pl.BlockSpec((None, 2, P), lambda n: (n, 0, 0))]
    scratch1 = [pltpu.VMEM((H + 2, W + 2, Ci), pad1_dtype)]
    if use_col1:
        scratch1.append(pltpu.VMEM((Ho * Wo, 9 * Ci), MXU_DTYPE))
    flops1 = 2 * count * 9 * Ci * Pout1
    bytes1 = int(4 * x.size + 2 * w1p.size + 2 * count * Pout1
                 + 4 * N * 2 * Pout1)
    outs1 = pl.pallas_call(
        k1,
        grid=(N,),
        in_specs=[pl.BlockSpec((None, H, W, Ci), lambda n: (n, 0, 0, 0)),
                  pl.BlockSpec((9 * Ci, Pout1), lambda n: (0, 0))],
        out_specs=tuple(out_specs1),
        out_shape=tuple(out_shapes1),
        scratch_shapes=scratch1,
        compiler_params=cparams(dimension_semantics=("parallel",)),
        cost_estimate=pl.CostEstimate(flops=flops1, transcendentals=0,
                                      bytes_accessed=bytes1),
    )(x, w1p)
    if use_proj:
        y1, s1, ysc, ssc = outs1
    else:
        y1, s1 = outs1

    # tiny (2,P) cross-image reduction of the partial statistics (XLA glue)
    s1sum = jnp.sum(s1, axis=0)

    # ---------- pass 2: bn1+relu fused into conv2 + partial BN2 stats --------
    k2 = _make_conv2_kernel(P, Ho, Wo, inv_count, use_col2)
    scratch2 = [pltpu.VMEM((Ho + 2, Wo + 2, P), MXU_DTYPE)]
    if use_col2:
        scratch2.append(pltpu.VMEM((Ho * Wo, 9 * P), MXU_DTYPE))
    flops2 = 2 * count * 9 * P * P
    bytes2 = int(2 * y1.size + 2 * w2p.size + 2 * count * P
                 + 4 * (N * 2 * P + 6 * P))
    y2, s2 = pl.pallas_call(
        k2,
        grid=(N,),
        in_specs=[
            pl.BlockSpec((None, Ho * Wo, P), lambda n: (n, 0, 0)),
            pl.BlockSpec((2, P), lambda n: (0, 0)),
            pl.BlockSpec((1, P), lambda n: (0, 0)),
            pl.BlockSpec((1, P), lambda n: (0, 0)),
            pl.BlockSpec((9 * P, P), lambda n: (0, 0)),
        ],
        out_specs=(pl.BlockSpec((None, Ho * Wo, P), lambda n: (n, 0, 0)),
                   pl.BlockSpec((None, 2, P), lambda n: (n, 0, 0))),
        out_shape=(jax.ShapeDtypeStruct((N, Ho * Wo, P), ACT_DTYPE),
                   jax.ShapeDtypeStruct((N, 2, P), f32)),
        scratch_shapes=scratch2,
        compiler_params=cparams(dimension_semantics=("parallel",)),
        cost_estimate=pl.CostEstimate(flops=flops2, transcendentals=N * P,
                                      bytes_accessed=bytes2),
    )(y1, s1sum, g1, b1, w2p)

    s2sum = jnp.sum(s2, axis=0)

    # ---------- pass 3: bn2 + shortcut(+bn) + relu, lane-dense & row-tiled ---
    R = count
    if P < 128 and 128 % P == 0 and R % (128 // P) == 0:
        k = 128 // P                           # pack k rows into the lane axis
    else:
        k = 1
    Rp, Cp = R // k, k * P

    def lanes(a):                              # tile per-channel vectors k times
        return jnp.tile(a, (1, k)) if k > 1 else a

    y2f = y2.reshape(Rp, Cp)
    TR = _row_tile(Rp)
    k3 = _make_merge_kernel(use_proj, inv_count)
    row_spec = pl.BlockSpec((TR, Cp), lambda i: (i, 0))
    chan2 = pl.BlockSpec((2, Cp), lambda i: (0, 0))
    chan1 = pl.BlockSpec((1, Cp), lambda i: (0, 0))
    if use_proj:
        gs = params["gs"].reshape(1, P).astype(f32)
        bs = params["bs"].reshape(1, P).astype(f32)
        k3_args = (y2f, lanes(s2sum), lanes(g2), lanes(b2),
                   ysc.reshape(Rp, Cp), lanes(jnp.sum(ssc, axis=0)),
                   lanes(gs), lanes(bs))
        in_specs3 = [row_spec, chan2, chan1, chan1,
                     row_spec, chan2, chan1, chan1]
    else:
        k3_args = (y2f, lanes(s2sum), lanes(g2), lanes(b2), x.reshape(Rp, Cp))
        in_specs3 = [row_spec, chan2, chan1, chan1, row_spec]
    out = pl.pallas_call(
        k3,
        grid=(Rp // TR,),
        in_specs=in_specs3,
        out_specs=row_spec,
        out_shape=jax.ShapeDtypeStruct((Rp, Cp), f32),
        compiler_params=cparams(dimension_semantics=("parallel",)),
        cost_estimate=pl.CostEstimate(flops=8 * R * P, transcendentals=4 * P,
                                      bytes_accessed=int(4 * 3 * R * P)),
    )(*k3_args)

    return out.reshape(N, Ho, Wo, P)


def basic_block(x_nchw, params, stride):
    """NCHW interface for parity with the PyTorch module."""
    # TODO(synk): when chaining blocks, call basic_block_nhwc directly and keep
    # activations NHWC to avoid these two extra HBM transpose passes.
    x = jnp.transpose(x_nchw, (0, 2, 3, 1)).astype(jnp.float32)
    out = basic_block_nhwc(x, params, stride)
    return jnp.transpose(out, (0, 3, 1, 2))


# --------------------------- pure-JAX reference --------------------------------
def reference(x_nchw, params, stride):
    """Reference with the same MXU precision (bf16 operands, f32 accumulate)."""
    x = jnp.transpose(x_nchw, (0, 2, 3, 1)).astype(jnp.float32)

    def conv(v, w, s, pad):
        return lax.conv_general_dilated(
            v.astype(MXU_DTYPE), w.astype(MXU_DTYPE), (s, s), pad,
            dimension_numbers=("NHWC", "HWIO", "NHWC"),
            preferred_element_type=jnp.float32)

    def bn(v, g, b):
        mu = v.mean((0, 1, 2), keepdims=True)
        var = jnp.square(v - mu).mean((0, 1, 2), keepdims=True)
        return (v - mu) * lax.rsqrt(var + EPS) * g + b

    out = jax.nn.relu(bn(conv(x, params["w1"], stride, [(1, 1), (1, 1)]),
                         params["g1"], params["b1"]))
    out = bn(conv(out, params["w2"], 1, [(1, 1), (1, 1)]),
             params["g2"], params["b2"])
    if "ws" in params:
        sc = bn(conv(x, params["ws"][None, None], stride, "VALID"),
                params["gs"], params["bs"])
    else:
        sc = x
    out = jax.nn.relu(out + sc)
    return jnp.transpose(out, (0, 3, 1, 2))


# ------------------------------ parameter init ---------------------------------
def init_params(key, in_planes, planes, needs_proj):
    ks = jax.random.split(key, 9)
    p = {
        "w1": 0.1 * jax.random.normal(ks[0], (3, 3, in_planes, planes), jnp.float32),
        "g1": 1.0 + 0.1 * jax.random.normal(ks[1], (planes,), jnp.float32),
        "b1": 0.1 * jax.random.normal(ks[2], (planes,), jnp.float32),
        "w2": 0.1 * jax.random.normal(ks[3], (3, 3, planes, planes), jnp.float32),
        "g2": 1.0 + 0.1 * jax.random.normal(ks[4], (planes,), jnp.float32),
        "b2": 0.1 * jax.random.normal(ks[5], (planes,), jnp.float32),
    }
    if needs_proj:
        p["ws"] = 0.1 * jax.random.normal(ks[6], (in_planes, planes), jnp.float32)
        p["gs"] = 1.0 + 0.1 * jax.random.normal(ks[7], (planes,), jnp.float32)
        p["bs"] = 0.1 * jax.random.normal(ks[8], (planes,), jnp.float32)
    return p


def _check(name, y, r):
    err = jnp.abs(y - r)
    mean_err = float(jnp.mean(err))
    max_err = float(jnp.max(err))
    # bf16 MXU operands + bf16 inter-pass activation storage (y1/ysc/y2) vs an
    # f32-activation reference: expect a few e-3 mean / few e-2 max drift.
    assert mean_err < 1e-2 and max_err < 1e-1, (name, mean_err, max_err)


# ----------------------------------- main ---------------------------------------
if __name__ == "__main__":
    N, Cin, H, W = 2, 4, 16, 16
    x = jax.random.normal(jax.random.PRNGKey(0), (N, Cin, H, W), jnp.float32)

    # Case 1: projection shortcut (in_planes=4, planes=8, stride=2)
    p_proj = init_params(jax.random.PRNGKey(1), Cin, 8, needs_proj=True)
    y_proj = jax.block_until_ready(basic_block(x, p_proj, stride=2))
    r_proj = reference(x, p_proj, stride=2)
    assert y_proj.shape == (N, 8, H // 2, W // 2)
    _check("proj", y_proj, r_proj)

    # Case 2: identity shortcut (in_planes=planes=4, stride=1)
    p_id = init_params(jax.random.PRNGKey(2), Cin, Cin, needs_proj=False)
    y_id = jax.block_until_ready(basic_block(x, p_id, stride=1))
    r_id = reference(x, p_id, stride=1)
    assert y_id.shape == (N, Cin, H, W)
    _check("identity", y_id, r_id)

    print("KERNEL_OK")
</pallas_src>

<mosaic_0001>
module attributes {stable_mosaic.version = 11 : i64} {
  func.func @kernel(%arg0: i32, %arg1: memref<1x16x16x4xf32, #tpu.memory_space<vmem>>, %arg2: memref<36x16xbf16, #tpu.memory_space<vmem>>, %arg3: memref<1x64x8xbf16, #tpu.memory_space<vmem>>, %arg4: memref<1x2x8xf32, #tpu.memory_space<vmem>>, %arg5: memref<1x64x8xbf16, #tpu.memory_space<vmem>>, %arg6: memref<1x2x8xf32, #tpu.memory_space<vmem>>, %arg7: memref<18x18x4xf32, #tpu.memory_space<vmem>>, %arg8: memref<64x36xbf16, #tpu.memory_space<vmem>>) attributes {dimension_semantics = [#tpu.dimension_semantics<parallel>], iteration_bounds = array<i64: 2>, scalar_prefetch = 0 : i64, scratch_operands = 2 : i64, tpu.core_type = #tpu.core_type<tc>, window_params = [{transform_indices = @transform_0, window_bounds = array<i64: 1, 16, 16, 4>}, {pipeline_mode = #tpu.pipeline_mode<synchronous>, transform_indices = @transform_1, window_bounds = array<i64: 36, 16>}, {transform_indices = @transform_2, window_bounds = array<i64: 1, 64, 8>}, {transform_indices = @transform_3, window_bounds = array<i64: 1, 2, 8>}, {transform_indices = @transform_4, window_bounds = array<i64: 1, 64, 8>}, {transform_indices = @transform_5, window_bounds = array<i64: 1, 2, 8>}]} {
    %cst = arith.constant 0.000000e+00 : f32
    %0 = vector.broadcast %cst : f32 to vector<1x18x4xf32>
    %c0 = arith.constant 0 : index
    %c0_0 = arith.constant 0 : index
    %c0_1 = arith.constant 0 : index
    %1 = vector.load %arg7[%c0, %c0_0, %c0_1] : memref<18x18x4xf32, #tpu.memory_space<vmem>>, vector<1x18x4xf32>
    tpu.vector_store %arg7[%c0, %c0_0, %c0_1], %0 {strides = array<i32>} : memref<18x18x4xf32, #tpu.memory_space<vmem>>, vector<1x18x4xf32>,
    %cst_2 = arith.constant 0.000000e+00 : f32
    %2 = vector.broadcast %cst_2 : f32 to vector<1x18x4xf32>
    %c17 = arith.constant 17 : index
    %c0_3 = arith.constant 0 : index
    %c0_4 = arith.constant 0 : index
    %3 = vector.load %arg7[%c17, %c0_3, %c0_4] : memref<18x18x4xf32, #tpu.memory_space<vmem>>, vector<1x18x4xf32>
    tpu.vector_store %arg7[%c17, %c0_3, %c0_4], %2 {strides = array<i32>} : memref<18x18x4xf32, #tpu.memory_space<vmem>>, vector<1x18x4xf32>,
    %cst_5 = arith.constant 0.000000e+00 : f32
    %4 = vector.broadcast %cst_5 : f32 to vector<18x1x4xf32>
    %c0_6 = arith.constant 0 : index
    %c0_7 = arith.constant 0 : index
    %c0_8 = arith.constant 0 : index
    %5 = vector.load %arg7[%c0_6, %c0_7, %c0_8] : memref<18x18x4xf32, #tpu.memory_space<vmem>>, vector<18x1x4xf32>
    tpu.vector_store %arg7[%c0_6, %c0_7, %c0_8], %4 {strides = array<i32>} : memref<18x18x4xf32, #tpu.memory_space<vmem>>, vector<18x1x4xf32>,
    %cst_9 = arith.constant 0.000000e+00 : f32
    %6 = vector.broadcast %cst_9 : f32 to vector<18x1x4xf32>
    %c0_10 = arith.constant 0 : index
    %c17_11 = arith.constant 17 : index
    %c0_12 = arith.constant 0 : index
    %7 = vector.load %arg7[%c0_10, %c17_11, %c0_12] : memref<18x18x4xf32, #tpu.memory_space<vmem>>, vector<18x1x4xf32>
    tpu.vector_store %arg7[%c0_10, %c17_11, %c0_12], %6 {strides = array<i32>} : memref<18x18x4xf32, #tpu.memory_space<vmem>>, vector<18x1x4xf32>,
    %c0_13 = arith.constant 0 : index
    %c0_14 = arith.constant 0 : index
    %c0_15 = arith.constant 0 : index
    %c0_16 = arith.constant 0 : index
    %8 = vector.load %arg1[%c0_13, %c0_14, %c0_15, %c0_16] : memref<1x16x16x4xf32, #tpu.memory_space<vmem>>, vector<1x16x16x4xf32>
    %9 = vector.shape_cast %8 : vector<1x16x16x4xf32> to vector<16x16x4xf32>
    %c1 = arith.constant 1 : index
    %c1_17 = arith.constant 1 : index
    %c0_18 = arith.constant 0 : index
    %10 = vector.load %arg7[%c1, %c1_17, %c0_18] : memref<18x18x4xf32, #tpu.memory_space<vmem>>, vector<16x16x4xf32>
    tpu.vector_store %arg7[%c1, %c1_17, %c0_18], %9 {strides = array<i32>} : memref<18x18x4xf32, #tpu.memory_space<vmem>>, vector<16x16x4xf32>,
    %c0_19 = arith.constant 0 : index
    %c0_20 = arith.constant 0 : index
    %c0_21 = arith.constant 0 : index
    %11 = tpu.strided_load %arg7[%c0_19, %c0_20, %c0_21] {strides = array<i32: 2, 2, 1>} : memref<18x18x4xf32, #tpu.memory_space<vmem>>, vector<8x8x4xf32>
    %12 = vector.shape_cast %11 : vector<8x8x4xf32> to vector<64x4xf32>
    %13 = arith.truncf %12 : vector<64x4xf32> to vector<64x4xbf16>
    %c0_22 = arith.constant 0 : index
    %c0_23 = arith.constant 0 : index
    %14 = vector.load %arg8[%c0_22, %c0_23] : memref<64x36xbf16, #tpu.memory_space<vmem>>, vector<64x4xbf16>
    tpu.vector_store %arg8[%c0_22, %c0_23], %13 {strides = array<i32>} : memref<64x36xbf16, #tpu.memory_space<vmem>>, vector<64x4xbf16>,
    %c0_24 = arith.constant 0 : index
    %c1_25 = arith.constant 1 : index
    %c0_26 = arith.constant 0 : index
    %15 = tpu.strided_load %arg7[%c0_24, %c1_25, %c0_26] {strides = array<i32: 2, 2, 1>} : memref<18x18x4xf32, #tpu.memory_space<vmem>>, vector<8x8x4xf32>
    %16 = vector.shape_cast %15 : vector<8x8x4xf32> to vector<64x4xf32>
    %17 = arith.truncf %16 : vector<64x4xf32> to vector<64x4xbf16>
    %c0_27 = arith.constant 0 : index
    %c4 = arith.constant 4 : index
    %18 = vector.load %arg8[%c0_27, %c4] : memref<64x36xbf16, #tpu.memory_space<vmem>>, vector<64x4xbf16>
    tpu.vector_store %arg8[%c0_27, %c4], %17 {strides = array<i32>} : memref<64x36xbf16, #tpu.memory_space<vmem>>, vector<64x4xbf16>,
    %c0_28 = arith.constant 0 : index
    %c2 = arith.constant 2 : index
    %c0_29 = arith.constant 0 : index
    %19 = tpu.strided_load %arg7[%c0_28, %c2, %c0_29] {strides = array<i32: 2, 2, 1>} : memref<18x18x4xf32, #tpu.memory_space<vmem>>, vector<8x8x4xf32>
    %20 = vector.shape_cast %19 : vector<8x8x4xf32> to vector<64x4xf32>
    %21 = arith.truncf %20 : vector<64x4xf32> to vector<64x4xbf16>
    %c0_30 = arith.constant 0 : index
    %c8 = arith.constant 8 : index
    %22 = vector.load %arg8[%c0_30, %c8] : memref<64x36xbf16, #tpu.memory_space<vmem>>, vector<64x4xbf16>
    tpu.vector_store %arg8[%c0_30, %c8], %21 {strides = array<i32>} : memref<64x36xbf16, #tpu.memory_space<vmem>>, vector<64x4xbf16>,
    %c1_31 = arith.constant 1 : index
    %c0_32 = arith.constant 0 : index
    %c0_33 = arith.constant 0 : index
    %23 = tpu.strided_load %arg7[%c1_31, %c0_32, %c0_33] {strides = array<i32: 2, 2, 1>} : memref<18x18x4xf32, #tpu.memory_space<vmem>>, vector<8x8x4xf32>
    %24 = vector.shape_cast %23 : vector<8x8x4xf32> to vector<64x4xf32>
    %25 = arith.truncf %24 : vector<64x4xf32> to vector<64x4xbf16>
    %c0_34 = arith.constant 0 : index
    %c12 = arith.constant 12 : index
    %26 = vector.load %arg8[%c0_34, %c12] : memref<64x36xbf16, #tpu.memory_space<vmem>>, vector<64x4xbf16>
    tpu.vector_store %arg8[%c0_34, %c12], %25 {strides = array<i32>} : memref<64x36xbf16, #tpu.memory_space<vmem>>, vector<64x4xbf16>,
    %c1_35 = arith.constant 1 : index
    %c1_36 = arith.constant 1 : index
    %c0_37 = arith.constant 0 : index
    %27 = tpu.strided_load %arg7[%c1_35, %c1_36, %c0_37] {strides = array<i32: 2, 2, 1>} : memref<18x18x4xf32, #tpu.memory_space<vmem>>, vector<8x8x4xf32>
    %28 = vector.shape_cast %27 : vector<8x8x4xf32> to vector<64x4xf32>
    %29 = arith.truncf %28 : vector<64x4xf32> to vector<64x4xbf16>
    %c0_38 = arith.constant 0 : index
    %c16 = arith.constant 16 : index
    %30 = vector.load %arg8[%c0_38, %c16] : memref<64x36xbf16, #tpu.memory_space<vmem>>, vector<64x4xbf16>
    tpu.vector_store %arg8[%c0_38, %c16], %29 {strides = array<i32>} : memref<64x36xbf16, #tpu.memory_space<vmem>>, vector<64x4xbf16>,
    %c1_39 = arith.constant 1 : index
    %c2_40 = arith.constant 2 : index
    %c0_41 = arith.constant 0 : index
    %31 = tpu.strided_load %arg7[%c1_39, %c2_40, %c0_41] {strides = array<i32: 2, 2, 1>} : memref<18x18x4xf32, #tpu.memory_space<vmem>>, vector<8x8x4xf32>
    %32 = vector.shape_cast %31 : vector<8x8x4xf32> to vector<64x4xf32>
    %33 = arith.truncf %32 : vector<64x4xf32> to vector<64x4xbf16>
    %c0_42 = arith.constant 0 : index
    %c20 = arith.constant 20 : index
    %34 = vector.load %arg8[%c0_42, %c20] : memref<64x36xbf16, #tpu.memory_space<vmem>>, vector<64x4xbf16>
    tpu.vector_store %arg8[%c0_42, %c20], %33 {strides = array<i32>} : memref<64x36xbf16, #tpu.memory_space<vmem>>, vector<64x4xbf16>,
    %c2_43 = arith.constant 2 : index
    %c0_44 = arith.constant 0 : index
    %c0_45 = arith.constant 0 : index
    %35 = tpu.strided_load %arg7[%c2_43, %c0_44, %c0_45] {strides = array<i32: 2, 2, 1>} : memref<18x18x4xf32, #tpu.memory_space<vmem>>, vector<8x8x4xf32>
    %36 = vector.shape_cast %35 : vector<8x8x4xf32> to vector<64x4xf32>
    %37 = arith.truncf %36 : vector<64x4xf32> to vector<64x4xbf16>
    %c0_46 = arith.constant 0 : index
    %c24 = arith.constant 24 : index
    %38 = vector.load %arg8[%c0_46, %c24] : memref<64x36xbf16, #tpu.memory_space<vmem>>, vector<64x4xbf16>
    tpu.vector_store %arg8[%c0_46, %c24], %37 {strides = array<i32>} : memref<64x36xbf16, #tpu.memory_space<vmem>>, vector<64x4xbf16>,
    %c2_47 = arith.constant 2 : index
    %c1_48 = arith.constant 1 : index
    %c0_49 = arith.constant 0 : index
    %39 = tpu.strided_load %arg7[%c2_47, %c1_48, %c0_49] {strides = array<i32: 2, 2, 1>} : memref<18x18x4xf32, #tpu.memory_space<vmem>>, vector<8x8x4xf32>
    %40 = vector.shape_cast %39 : vector<8x8x4xf32> to vector<64x4xf32>
    %41 = arith.truncf %40 : vector<64x4xf32> to vector<64x4xbf16>
    %c0_50 = arith.constant 0 : index
    %c28 = arith.constant 28 : index
    %42 = vector.load %arg8[%c0_50, %c28] : memref<64x36xbf16, #tpu.memory_space<vmem>>, vector<64x4xbf16>
    tpu.vector_store %arg8[%c0_50, %c28], %41 {strides = array<i32>} : memref<64x36xbf16, #tpu.memory_space<vmem>>, vector<64x4xbf16>,
    %c2_51 = arith.constant 2 : index
    %c2_52 = arith.constant 2 : index
    %c0_53 = arith.constant 0 : index
    %43 = tpu.strided_load %arg7[%c2_51, %c2_52, %c0_53] {strides = array<i32: 2, 2, 1>} : memref<18x18x4xf32, #tpu.memory_space<vmem>>, vector<8x8x4xf32>
    %44 = vector.shape_cast %43 : vector<8x8x4xf32> to vector<64x4xf32>
    %45 = arith.truncf %44 : vector<64x4xf32> to vector<64x4xbf16>
    %c0_54 = arith.constant 0 : index
    %c32 = arith.constant 32 : index
    %46 = vector.load %arg8[%c0_54, %c32] : memref<64x36xbf16, #tpu.memory_space<vmem>>, vector<64x4xbf16>
    tpu.vector_store %arg8[%c0_54, %c32], %45 {strides = array<i32>} : memref<64x36xbf16, #tpu.memory_space<vmem>>, vector<64x4xbf16>,
    %c0_55 = arith.constant 0 : index
    %c0_56 = arith.constant 0 : index
    %47 = vector.load %arg8[%c0_55, %c0_56] : memref<64x36xbf16, #tpu.memory_space<vmem>>, vector<64x36xbf16>
    %c0_57 = arith.constant 0 : index
    %c0_58 = arith.constant 0 : index
    %48 = vector.load %arg2[%c0_57, %c0_58] : memref<36x16xbf16, #tpu.memory_space<vmem>>, vector<36x16xbf16>
    %cst_59 = arith.constant dense<0.000000e+00> : vector<64x16xf32>
    %49 = tpu.matmul %47, %48, %cst_59 {dimension_numbers = #tpu.dot_dimension_numbers<[1], [0], [0], [1], [0, 0, 1, 1], [], []>} : vector<64x36xbf16>, vector<36x16xbf16>, vector<64x16xf32> -> vector<64x16xf32>
    %50 = vector.extract_strided_slice %49 {offsets = [0, 0], sizes = [64, 8], strides = [1, 1]} : vector<64x16xf32> to vector<64x8xf32>
    %51 = arith.truncf %50 : vector<64x8xf32> to vector<64x8xbf16>
    %c0_60 = arith.constant 0 : index
    %c0_61 = arith.constant 0 : index
    %c0_62 = arith.constant 0 : index
    %52 = vector.load %arg3[%c0_60, %c0_61, %c0_62] : memref<1x64x8xbf16, #tpu.memory_space<vmem>>, vector<1x64x8xbf16>
    %53 = vector.shape_cast %52 : vector<1x64x8xbf16> to vector<64x8xbf16>
    %54 = vector.shape_cast %51 : vector<64x8xbf16> to vector<1x64x8xbf16>
    tpu.vector_store %arg3[%c0_60, %c0_61, %c0_62], %54 {strides = array<i32>} : memref<1x64x8xbf16, #tpu.memory_space<vmem>>, vector<1x64x8xbf16>,
    %cst_63 = arith.constant dense<0.000000e+00> : vector<8xf32>
    %55 = vector.multi_reduction <add>, %50, %cst_63 [0] : vector<64x8xf32> to vector<8xf32>
    %56 = vector.shape_cast %55 : vector<8xf32> to vector<1x8xf32>
    %c0_64 = arith.constant 0 : index
    %c0_65 = arith.constant 0 : index
    %c0_66 = arith.constant 0 : index
    %57 = vector.load %arg4[%c0_64, %c0_65, %c0_66] : memref<1x2x8xf32, #tpu.memory_space<vmem>>, vector<1x1x8xf32>
    %58 = vector.shape_cast %57 : vector<1x1x8xf32> to vector<1x8xf32>
    %59 = vector.shape_cast %56 : vector<1x8xf32> to vector<1x1x8xf32>
    tpu.vector_store %arg4[%c0_64, %c0_65, %c0_66], %59 {strides = array<i32>} : memref<1x2x8xf32, #tpu.memory_space<vmem>>, vector<1x1x8xf32>,
    %60 = arith.mulf %50, %50 : vector<64x8xf32>
    %cst_67 = arith.constant dense<0.000000e+00> : vector<8xf32>
    %61 = vector.multi_reduction <add>, %60, %cst_67 [0] : vector<64x8xf32> to vector<8xf32>
    %62 = vector.shape_cast %61 : vector<8xf32> to vector<1x8xf32>
    %c0_68 = arith.constant 0 : index
    %c1_69 = arith.constant 1 : index
    %c0_70 = arith.constant 0 : index
    %63 = vector.load %arg4[%c0_68, %c1_69, %c0_70] : memref<1x2x8xf32, #tpu.memory_space<vmem>>, vector<1x1x8xf32>
    %64 = vector.shape_cast %63 : vector<1x1x8xf32> to vector<1x8xf32>
    %65 = vector.shape_cast %62 : vector<1x8xf32> to vector<1x1x8xf32>
    tpu.vector_store %arg4[%c0_68, %c1_69, %c0_70], %65 {strides = array<i32>} : memref<1x2x8xf32, #tpu.memory_space<vmem>>, vector<1x1x8xf32>,
    %66 = vector.extract_strided_slice %49 {offsets = [0, 8], sizes = [64, 8], strides = [1, 1]} : vector<64x16xf32> to vector<64x8xf32>
    %67 = arith.truncf %66 : vector<64x8xf32> to vector<64x8xbf16>
    %c0_71 = arith.constant 0 : index
    %c0_72 = arith.constant 0 : index
    %c0_73 = arith.constant 0 : index
    %68 = vector.load %arg5[%c0_71, %c0_72, %c0_73] : memref<1x64x8xbf16, #tpu.memory_space<vmem>>, vector<1x64x8xbf16>
    %69 = vector.shape_cast %68 : vector<1x64x8xbf16> to vector<64x8xbf16>
    %70 = vector.shape_cast %67 : vector<64x8xbf16> to vector<1x64x8xbf16>
    tpu.vector_store %arg5[%c0_71, %c0_72, %c0_73], %70 {strides = array<i32>} : memref<1x64x8xbf16, #tpu.memory_space<vmem>>, vector<1x64x8xbf16>,
    %cst_74 = arith.constant dense<0.000000e+00> : vector<8xf32>
    %71 = vector.multi_reduction <add>, %66, %cst_74 [0] : vector<64x8xf32> to vector<8xf32>
    %72 = vector.shape_cast %71 : vector<8xf32> to vector<1x8xf32>
    %c0_75 = arith.constant 0 : index
    %c0_76 = arith.constant 0 : index
    %c0_77 = arith.constant 0 : index
    %73 = vector.load %arg6[%c0_75, %c0_76, %c0_77] : memref<1x2x8xf32, #tpu.memory_space<vmem>>, vector<1x1x8xf32>
    %74 = vector.shape_cast %73 : vector<1x1x8xf32> to vector<1x8xf32>
    %75 = vector.shape_cast %72 : vector<1x8xf32> to vector<1x1x8xf32>
    tpu.vector_store %arg6[%c0_75, %c0_76, %c0_77], %75 {strides = array<i32>} : memref<1x2x8xf32, #tpu.memory_space<vmem>>, vector<1x1x8xf32>,
    %76 = arith.mulf %66, %66 : vector<64x8xf32>
    %cst_78 = arith.constant dense<0.000000e+00> : vector<8xf32>
    %77 = vector.multi_reduction <add>, %76, %cst_78 [0] : vector<64x8xf32> to vector<8xf32>
    %78 = vector.shape_cast %77 : vector<8xf32> to vector<1x8xf32>
    %c0_79 = arith.constant 0 : index
    %c1_80 = arith.constant 1 : index
    %c0_81 = arith.constant 0 : index
    %79 = vector.load %arg6[%c0_79, %c1_80, %c0_81] : memref<1x2x8xf32, #tpu.memory_space<vmem>>, vector<1x1x8xf32>
    %80 = vector.shape_cast %79 : vector<1x1x8xf32> to vector<1x8xf32>
    %81 = vector.shape_cast %78 : vector<1x8xf32> to vector<1x1x8xf32>
    tpu.vector_store %arg6[%c0_79, %c1_80, %c0_81], %81 {strides = array<i32>} : memref<1x2x8xf32, #tpu.memory_space<vmem>>, vector<1x1x8xf32>,
    return
  }
  func.func @transform_0(%arg0: i32) -> (i32, i32, i32, i32) {
    %c0_i32 = arith.constant 0 : i32
    %c0_i32_0 = arith.constant 0 : i32
    %c0_i32_1 = arith.constant 0 : i32
    %c0_i32_2 = arith.constant 0 : i32
    return %arg0, %c0_i32, %c0_i32_0, %c0_i32_1 : i32, i32, i32, i32
  }
  func.func @transform_1(%arg0: i32) -> (i32, i32) {
    %c0_i32 = arith.constant 0 : i32
    %c0_i32_0 = arith.constant 0 : i32
    %c0_i32_1 = arith.constant 0 : i32
    return %c0_i32, %c0_i32_0 : i32, i32
  }
  func.func @transform_2(%arg0: i32) -> (i32, i32, i32) {
    %c0_i32 = arith.constant 0 : i32
    %c0_i32_0 = arith.constant 0 : i32
    %c0_i32_1 = arith.constant 0 : i32
    return %arg0, %c0_i32, %c0_i32_0 : i32, i32, i32
  }
  func.func @transform_3(%arg0: i32) -> (i32, i32, i32) {
    %c0_i32 = arith.constant 0 : i32
    %c0_i32_0 = arith.constant 0 : i32
    %c0_i32_1 = arith.constant 0 : i32
    return %arg0, %c0_i32, %c0_i32_0 : i32, i32, i32
  }
  func.func @transform_4(%arg0: i32) -> (i32, i32, i32) {
    %c0_i32 = arith.constant 0 : i32
    %c0_i32_0 = arith.constant 0 : i32
    %c0_i32_1 = arith.constant 0 : i32
    return %arg0, %c0_i32, %c0_i32_0 : i32, i32, i32
  }
  func.func @transform_5(%arg0: i32) -> (i32, i32, i32) {
    %c0_i32 = arith.constant 0 : i32
    %c0_i32_0 = arith.constant 0 : i32
    %c0_i32_1 = arith.constant 0 : i32
    return %arg0, %c0_i32, %c0_i32_0 : i32, i32, i32
  }
}

</mosaic_0001>

<bundles_post_ra>
// kernel: tpu_custom_call.1
= control target key start
LH: loop header
LB: loop body
LE: loop exit
PB: predicated region body
PF: predicated region fallthrough
CT: control target
= control target key end

     0   :  { %11 = vsyncpa [#allocation5], 0  ;;  %s1923_s0 = inlined_call_operand.vmem [shape: f32[2,16,16,4], index: 0, kind: input, shape index: {}]   ;;  %s1924_s1 = inlined_call_operand.vmem [shape: bf16[36,16], index: 1, kind: input, shape index: {}]   ;;  %s1925_s2 = inlined_call_operand.vmem [shape: bf16[2,64,8], index: 2, kind: output, shape index: {0}]   ;;  %s1926_s3 = inlined_call_operand.hbm [shape: f32[2,2,8], index: 3, kind: output, shape index: {1}]   ;;  %s1927_s4 = inlined_call_operand.vmem [shape: bf16[2,64,8], index: 4, kind: output, shape index: {2}]   ;;  %s1928_s5 = inlined_call_operand.hbm [shape: f32[2,2,8], index: 5, kind: output, shape index: {3}]  }
   0x1   :  { %13 = vsyncpa [#allocation5 + $0x1], 0 }
   0x2   :  { %14 = vsyncpa [#allocation7], 0 }
   0x3   :  { %16 = vsyncpa [#allocation7 + $0x1], 0  ;;  %s1509_s18 = smov 0   ;;  %s1511_s19 = smov 0  }
   0x4   :  { %s1513_s20 = smov 0   ;;  %s1515_s21 = smov 0  }
   0x5 LB: > { %s1530_s22 = sadd.s32 4294967295, %s1465_s21   ;;  %s1241_s23 = sadd.s32 4294967294, %s1465_s21   ;;  %s1465_s21 = sphi %s1515_s21, %s1936_s21   ;;  %s1461_s20 = sphi %s1513_s20, %s1935_s20   ;;  %s1457_s19 = sphi %s1511_s19, %s1934_s19   ;;  %s1453_s18 = sphi %s1509_s18, %s1933_s18  }
   0x6   : > { %s1534_s24 = sadd.s32 1, %s1465_s21   ;;  %s102_s25 = sadd.s32 1, %s1461_s20 }
   0x7   : > { %s99_s26 = ssub.s32 %s1465_s21, %s1534_s24  ;;  %p112_p0 = scmp.ne.s32.totalorder %s1461_s20, %s1457_s19 }
   0x8   : > { %p100_p1 = scmp.eq.s32.totalorder %s99_s26, 0  ;;  %p113_p2 = scmp.eq.s32.totalorder %s1530_s22, 1 }
   0x9   : > { %p118_p3 = scmp.ne.s32.totalorder %s1457_s19, %s1453_s18  ;;  %p119_p4 = scmp.eq.s32.totalorder %s1241_s23, 1 }
   0xa   : > { %s1545_s27 = scalar_select %p100_p1, %s1461_s20, %s102_s25  }
   0xb   : > { %p1547_p5 = por %p113_p2, %p112_p0  ;;  %p1551_p6 = por %p119_p4, %p118_p3 }
   0xc   : > { %p1244_p7 = scmp.ge.s32.totalorder %s1465_s21, 1  ;;  %p200_p8 = scmp.lt.s32.totalorder %s1465_s21, 3 }
   0xe   : > { %p201_p9 = pnand %p1244_p7, %p200_p8 }
   0xf   : > { %p243_p10 = scmp.lt.s32.totalorder (!%p201_p9), %s1530_s22, 1  ;;  %vm259_vm0 = vcmask (!%p201_p9), 31744   ;;  %vm268_vm1 = vcmask (!%p201_p9), 24576   ;;  %vm262_vm2 = vcmask (!%p201_p9), 25600   ;;  %v1467_v0 = vmov (!%p201_p9), 0.0   ;;  %s1468_s10 = smov (!%p201_p9), 4  }
  0x10   : > { %204 = sbr.rel (%p201_p9) target bundleno = 592 (0x250), region = 28  ;;  %260 = vst.msk [vmem:[#allocation2] sm:$0xff] (!%p201_p9), %vm259_vm0, %v1467_v0  ;;  %261 = vst.msk [vmem:[#allocation2 + $0x8] sm:$0xff] (!%p201_p9), %vm259_vm0, %v1467_v0  ;;  %s1469_s11 = smov (!%p201_p9), 8   ;;  %vm757_vm3 = vcmask (!%p201_p9), 1041408   ;;  %vm429_vm4 = vcmask (!%p201_p9), 64544  }
  0x11   : > { %270 = vst.msk [vmem:[#allocation2 + $0x18] sm:$0x1] (!%p201_p9), %vm268_vm1, %v1467_v0  ;;  %271 = vst.msk [vmem:[#allocation2 + $0x30] sm:$0x1] (!%p201_p9), %vm268_vm1, %v1467_v0  ;;  %s1470_s12 = smov (!%p201_p9), 12   ;;  %s1471_s13 = smov (!%p201_p9), 16  }
  0x12   : > { %272 = vst.msk [vmem:[#allocation2 + $0x48] sm:$0x1] (!%p201_p9), %vm268_vm1, %v1467_v0  ;;  %273 = vst.msk [vmem:[#allocation2 + $0x60] sm:$0x1] (!%p201_p9), %vm268_vm1, %v1467_v0  ;;  %s1472_s14 = smov (!%p201_p9), 20   ;;  %s1473_s17 = smov (!%p201_p9), 24  }
  0x13   : > { %274 = vst.msk [vmem:[#allocation2 + $0x78] sm:$0x1] (!%p201_p9), %vm268_vm1, %v1467_v0  ;;  %275 = vst.msk [vmem:[#allocation2 + $0x90] sm:$0x1] (!%p201_p9), %vm268_vm1, %v1467_v0  ;;  %s1474_s26 = smov (!%p201_p9), 28   ;;  %s1475_s8 = smov (!%p201_p9), 32  }
  0x14   : > { %276 = vst.msk [vmem:[#allocation2 + $0xa8] sm:$0x1] (!%p201_p9), %vm268_vm1, %v1467_v0  ;;  %277 = vst.msk [vmem:[#allocation2 + $0xc0] sm:$0x1] (!%p201_p9), %vm268_vm1, %v1467_v0  ;;  %vm470_vm5 = vcmask (!%p201_p9), 97344   ;;  %vm510_vm6 = vcmask (!%p201_p9), 130144  }
  0x15   : > { %278 = vst.msk [vmem:[#allocation2 + $0xd8] sm:$0x1] (!%p201_p9), %vm268_vm1, %v1467_v0  ;;  %279 = vst.msk [vmem:[#allocation2 + $0xf0] sm:$0x1] (!%p201_p9), %vm268_vm1, %v1467_v0  ;;  %vm551_vm7 = vcmask (!%p201_p9), 162944   ;;  %vm592_vm8 = vcmask (!%p201_p9), 195744  }
  0x16   : > { %280 = vst.msk [vmem:[#allocation2 + $0x108] sm:$0x1] (!%p201_p9), %vm268_vm1, %v1467_v0  ;;  %281 = vst.msk [vmem:[#allocation2 + $0x120] sm:$0x1] (!%p201_p9), %vm268_vm1, %v1467_v0  ;;  %vm633_vm9 = vcmask (!%p201_p9), 228544   ;;  %vm674_vm10 = vcmask (!%p201_p9), 261344  }
  0x17   : > { %282 = vst.msk [vmem:[#allocation2 + $0x138] sm:$0x1] %vm268_vm1, %v1467_v0  ;;  %283 = vst.msk [vmem:[#allocation2 + $0x150] sm:$0x1] %vm268_vm1, %v1467_v0  ;;  %s1580_s30 = scalar_select %p243_p10, %s1530_s22, 1  ;;  %vm715_vm11 = vcmask 294144  }
  0x18   : > { %284 = vst.msk [vmem:[#allocation2 + $0x168] sm:$0x1] %vm268_vm1, %v1467_v0  ;;  %285 = vst.msk [vmem:[#allocation2 + $0x180] sm:$0x1] %vm268_vm1, %v1467_v0  ;;  %v394_v11 = vld [vmem:[#allocation2 + $0x1] ss:$2 sm:$0xff] }
  0x19   : > { %263 = vst.msk [vmem:[#allocation2 + $0x10] sm:$0x3] %vm262_vm2, %v1467_v0  ;;  %s1274_s6 = sshll.u32 %s1580_s30, 8  ;;  %vm744_vm12 = vcmask 293888   ;;  %vm867_vm13 = vcmask 64512   ;;  %vm953_vm14 = vcmask 130112  }
  0x1a   : > { %269 = vst.msk [vmem:[#allocation2] sm:$0x1] %vm268_vm1, %v1467_v0  ;;  %s1587_s9 = scalar_lea.vmem %s1923_s0, %s1274_s6  ;;  %vm858_vm15 = vcmask 60416   ;;  %s1929_s16 = sshll.u32 %s1530_s22, 5 }
  0x1b   : > { %v307_v1 = vld [vmem:[%s1587_s9 + $0x10] sm:$0xff]  ;;  %v308_v2 = vld [vmem:[%s1587_s9 + $0x18] sm:$0xff]  ;;  %v305_v7 = vld [vmem:[%s1587_s9] sm:$0xff]  ;;  %s1815_s6 = scalar_lea.hbm %s1926_s3, %s1929_s16 }
  0x1c   : > { %v311_v3 = vld [vmem:[%s1587_s9 + $0x30] sm:$0xff]  ;;  %340 = vst.msk [vmem:[#allocation2 + $0x31] sm:$0xff] %vm259_vm0, %v307_v1  ;;  %341 = vst.msk [vmem:[#allocation2 + $0x39] sm:$0xff] %vm259_vm0, %v308_v2  ;;  %v312_v4 = vld [vmem:[%s1587_s9 + $0x38] sm:$0xff] }
  0x1d   : > { %v315_v5 = vld [vmem:[%s1587_s9 + $0x50] sm:$0xff]  ;;  %v316_v6 = vld [vmem:[%s1587_s9 + $0x58] sm:$0xff]  ;;  %344 = vst.msk [vmem:[#allocation2 + $0x61] sm:$0xff] %vm259_vm0, %v311_v3  ;;  %345 = vst.msk [vmem:[#allocation2 + $0x69] sm:$0xff] %vm259_vm0, %v312_v4 }
  0x1e   : > { %348 = vst.msk [vmem:[#allocation2 + $0x91] sm:$0xff] %vm259_vm0, %v315_v5  ;;  %349 = vst.msk [vmem:[#allocation2 + $0x99] sm:$0xff] %vm259_vm0, %v316_v6  ;;  %v306_v8 = vld [vmem:[%s1587_s9 + $0x8] sm:$0xff]  ;;  %v309_v9 = vld [vmem:[%s1587_s9 + $0x20] sm:$0xff] }
  0x1f   : > { %v310_v10 = vld [vmem:[%s1587_s9 + $0x28] sm:$0xff]  ;;  %338 = vst.msk [vmem:[#allocation2 + $0x19] sm:$0xff] %vm259_vm0, %v305_v7  ;;  %339 = vst.msk [vmem:[#allocation2 + $0x21] sm:$0xff] %vm259_vm0, %v306_v8  ;;  %v313_v13 = vld [vmem:[%s1587_s9 + $0x40] sm:$0xff] }
  0x20   : > { %v435_v12 = vld [vmem:[#allocation2 + $0x2] ss:$2 sm:$0xff]  ;;  %342 = vst.msk [vmem:[#allocation2 + $0x49] sm:$0xff] %vm259_vm0, %v309_v9  ;;  %343 = vst.msk [vmem:[#allocation2 + $0x51] sm:$0xff] %vm259_vm0, %v310_v10  ;;  %v320_v18 = vld [vmem:[%s1587_s9 + $0x78] sm:$0xff] }
  0x21   : > { %v314_v14 = vld [vmem:[%s1587_s9 + $0x48] sm:$0xff]  ;;  %v317_v15 = vld [vmem:[%s1587_s9 + $0x60] sm:$0xff]  ;;  %346 = vst.msk [vmem:[#allocation2 + $0x79] sm:$0xff] %vm259_vm0, %v313_v13  ;;  %v319_v17 = vld [vmem:[%s1587_s9 + $0x70] sm:$0xff] }
  0x22   : > { %v318_v16 = vld [vmem:[%s1587_s9 + $0x68] sm:$0xff]  ;;  %347 = vst.msk [vmem:[#allocation2 + $0x81] sm:$0xff] %vm259_vm0, %v314_v14  ;;  %350 = vst.msk [vmem:[#allocation2 + $0xa9] sm:$0xff] %vm259_vm0, %v317_v15  ;;  %v323_v19 = vld [vmem:[%s1587_s9 + $0x90] sm:$0xff] }
  0x23   : > { %351 = vst.msk [vmem:[#allocation2 + $0xb1] sm:$0xff] %vm259_vm0, %v318_v16  ;;  %352 = vst.msk [vmem:[#allocation2 + $0xc1] sm:$0xff] %vm259_vm0, %v319_v17  ;;  %v324_v20 = vld [vmem:[%s1587_s9 + $0x98] sm:$0xff]  ;;  %v327_v21 = vld [vmem:[%s1587_s9 + $0xb0] sm:$0xff] }
  0x24   : > { %353 = vst.msk [vmem:[#allocation2 + $0xc9] sm:$0xff] %vm259_vm0, %v320_v18  ;;  %356 = vst.msk [vmem:[#allocation2 + $0xf1] sm:$0xff] %vm259_vm0, %v323_v19  ;;  %v328_v22 = vld [vmem:[%s1587_s9 + $0xb8] sm:$0xff]  ;;  %v331_v23 = vld [vmem:[%s1587_s9 + $0xd0] sm:$0xff] }
  0x25   : > { %357 = vst.msk [vmem:[#allocation2 + $0xf9] sm:$0xff] %vm259_vm0, %v324_v20  ;;  %v332_v24 = vld [vmem:[%s1587_s9 + $0xd8] sm:$0xff]  ;;  %360 = vst.msk [vmem:[#allocation2 + $0x121] sm:$0xff] %vm259_vm0, %v327_v21  ;;  %v398_v29 = vld [vmem:[#allocation2 + $0x61] ss:$2 sm:$0xff] }
  0x26   : > { %v396_v25 = vld [vmem:[#allocation2 + $0x31] ss:$2 sm:$0xff]  ;;  %v437_v26 = vld [vmem:[#allocation2 + $0x32] ss:$2 sm:$0xff]  ;;  %361 = vst.msk [vmem:[#allocation2 + $0x129] sm:$0xff] %vm259_vm0, %v328_v22  ;;  %364 = vst.msk [vmem:[#allocation2 + $0x151] sm:$0xff] %vm259_vm0, %v331_v23 }
  0x27   : > { %365 = vst.msk [vmem:[#allocation2 + $0x159] sm:$0xff] %vm259_vm0, %v332_v24  ;;  %v409_v27 = vpack.c.bf16 %v396_v25, %v394_v11  ;;  %v450_v28 = vpack.c.bf16 %v437_v26, %v435_v12  ;;  %v400_v30 = vld [vmem:[#allocation2 + $0x91] ss:$2 sm:$0xff]  ;;  %v439_v31 = vld [vmem:[#allocation2 + $0x62] ss:$2 sm:$0xff] }
  0x28   : > { %v441_v32 = vld [vmem:[#allocation2 + $0x92] ss:$2 sm:$0xff]  ;;  %v410_v33 = vpack.c.bf16 %v400_v30, %v398_v29  ;;  %v516_v41 = vld [vmem:[#allocation2 + $0x19] ss:$2 sm:$0xff]  ;;  %v518_v42 = vld [vmem:[#allocation2 + $0x49] ss:$2 sm:$0xff] }
  0x29   : > { %417 = vrot.lane.b32.xlu0 %v409_v27, %s1468_s10  ;;  %458 = vrot.lane.b32.xlu1 %v450_v28, %s1469_s11  ;;  %v451_v34 = vpack.c.bf16 %v441_v32, %v439_v31  ;;  %v475_v35 = vld [vmem:[#allocation2 + $0x18] ss:$2 sm:$0xff]  ;;  %v477_v36 = vld [vmem:[#allocation2 + $0x48] ss:$2 sm:$0xff]  ;;  %v520_v43 = vld [vmem:[#allocation2 + $0x79] ss:$2 sm:$0xff]  ;;  %v531_v45 = vpack.c.bf16 %v518_v42, %v516_v41 }
  0x2a   : > { %v479_v37 = vld [vmem:[#allocation2 + $0x78] ss:$2 sm:$0xff]  ;;  %v481_v38 = vld [vmem:[#allocation2 + $0xa8] ss:$2 sm:$0xff]  ;;  %v490_v39 = vpack.c.bf16 %v477_v36, %v475_v35  ;;  %v522_v44 = vld [vmem:[#allocation2 + $0xa9] ss:$2 sm:$0xff] }
  0x2b   : > { %v491_v40 = vpack.c.bf16 %v481_v38, %v479_v37  ;;  %v532_v46 = vpack.c.bf16 %v522_v44, %v520_v43  ;;  %v557_v47 = vld [vmem:[#allocation2 + $0x1a] ss:$2 sm:$0xff]  ;;  %v559_v48 = vld [vmem:[#allocation2 + $0x4a] ss:$2 sm:$0xff]  ;;  %v639_v3 = vld [vmem:[#allocation2 + $0x31] ss:$2 sm:$0xff] }
  0x2c   : > { %v561_v49 = vld [vmem:[#allocation2 + $0x7a] ss:$2 sm:$0xff]  ;;  %v563_v50 = vld [vmem:[#allocation2 + $0xaa] ss:$2 sm:$0xff]  ;;  %v572_v59 = vpack.c.bf16 %v559_v48, %v557_v47  ;;  %v641_v4 = vld [vmem:[#allocation2 + $0x61] ss:$2 sm:$0xff] }
  0x2d   : > { %419 = vrot.lane.b32.xlu0 %v410_v33, %s1468_s10  ;;  %460 = vrot.lane.b32.xlu1 %v451_v34, %s1469_s11  ;;  %v321_v51 = vld [vmem:[%s1587_s9 + $0x80] sm:$0xff]  ;;  %v322_v52 = vld [vmem:[%s1587_s9 + $0x88] sm:$0xff]  ;;  %v598_v55 = vld [vmem:[#allocation2 + $0x30] ss:$2 sm:$0xff]  ;;  %v573_v60 = vpack.c.bf16 %v563_v50, %v561_v49  ;;  %v654_v16 = vpack.c.bf16 %v641_v4, %v639_v3 }
  0x2e   : > { %v325_v53 = vld [vmem:[%s1587_s9 + $0xa0] sm:$0xff]  ;;  %v326_v54 = vld [vmem:[%s1587_s9 + $0xa8] sm:$0xff]  ;;  %354 = vst.msk [vmem:[#allocation2 + $0xd9] sm:$0xff] %vm259_vm0, %v321_v51  ;;  %355 = vst.msk [vmem:[#allocation2 + $0xe1] sm:$0xff] %vm259_vm0, %v322_v52 }
  0x2f   : > { %358 = vst.msk [vmem:[#allocation2 + $0x109] sm:$0xff] %vm259_vm0, %v325_v53  ;;  %359 = vst.msk [vmem:[#allocation2 + $0x111] sm:$0xff] %vm259_vm0, %v326_v54  ;;  %v329_v56 = vld [vmem:[%s1587_s9 + $0xc0] sm:$0xff]  ;;  %v330_v57 = vld [vmem:[%s1587_s9 + $0xc8] sm:$0xff] }
  0x30   : > { %v333_v58 = vld [vmem:[%s1587_s9 + $0xe0] sm:$0xff]  ;;  %v602_v62 = vld [vmem:[#allocation2 + $0x90] ss:$2 sm:$0xff]  ;;  %v334_v63 = vld [vmem:[%s1587_s9 + $0xe8] sm:$0xff]  ;;  %362 = vst.msk [vmem:[#allocation2 + $0x139] sm:$0xff] %vm259_vm0, %v329_v56 }
  0x31   : > { %498 = vrot.lane.b32.xlu0 %v490_v39, %s1470_s12  ;;  %500 = vrot.lane.b32.xlu1 %v491_v40, %s1470_s12  ;;  %v600_v61 = vld [vmem:[#allocation2 + $0x60] ss:$2 sm:$0xff]  ;;  %363 = vst.msk [vmem:[#allocation2 + $0x141] sm:$0xff] %vm259_vm0, %v330_v57  ;;  %366 = vst.msk [vmem:[#allocation2 + $0x169] sm:$0xff] %vm259_vm0, %v333_v58  ;;  %v335_v1 = vld [vmem:[%s1587_s9 + $0xf0] sm:$0xff] }
  0x32   : > { %v604_v0 = vld [vmem:[#allocation2 + $0xc0] ss:$2 sm:$0xff]  ;;  %367 = vst.msk [vmem:[#allocation2 + $0x171] sm:$0xff] %vm259_vm0, %v334_v63  ;;  %v336_v2 = vld [vmem:[%s1587_s9 + $0xf8] sm:$0xff]  ;;  %368 = vst.msk [vmem:[#allocation2 + $0x181] sm:$0xff] %vm259_vm0, %v335_v1  ;;  %v613_v6 = vpack.c.bf16 %v600_v61, %v598_v55  ;;  %s1275_s9 = sshll.u32 %s1580_s30, 5 }
  0x33   : > { %369 = vst.msk [vmem:[#allocation2 + $0x189] sm:$0xff] %vm259_vm0, %v336_v2  ;;  %v643_v5 = vld [vmem:[#allocation2 + $0x91] ss:$2 sm:$0xff]  ;;  %v614_v7 = vpack.c.bf16 %v604_v0, %v602_v62  ;;  %v370_v8 = vld [vmem:[#allocation2] ss:$2 sm:$0xff] }
  0x34   : > { %v372_v9 = vld [vmem:[#allocation2 + $0x30] ss:$2 sm:$0xff]  ;;  %v374_v10 = vld [vmem:[#allocation2 + $0x60] ss:$2 sm:$0xff]  ;;  %v645_v11 = vld [vmem:[#allocation2 + $0xc1] ss:$2 sm:$0xff] }
  0x35   : > { %539 = vrot.lane.b32.xlu0 %v531_v45, %s1471_s13  ;;  %541 = vrot.lane.b32.xlu1 %v532_v46, %s1471_s13  ;;  %v385_v12 = vpack.c.bf16 %v372_v9, %v370_v8  ;;  %v376_v13 = vld [vmem:[#allocation2 + $0x90] ss:$2 sm:$0xff]  ;;  %v1368_v14 = vld [vmem:[%s1924_s1] sm:$0xff]   ;;  %v655_v17 = vpack.c.bf16 %v645_v11, %v643_v5  ;;  %v404_v21 = vld [vmem:[#allocation2 + $0xf1] ss:$2 sm:$0xff] }
  0x36   : > { %v386_v15 = vpack.c.bf16 %v376_v13, %v374_v10  ;;  %1292 = vmatprep.subr.bf16.mxu0 %v1368_v14  ;;  %1306 = vmatprep.subr.bf16.mxu1 %v1368_v14  ;;  %v680_v18 = vld [vmem:[#allocation2 + $0x32] ss:$2 sm:$0xff]  ;;  %v682_v19 = vld [vmem:[#allocation2 + $0x62] ss:$2 sm:$0xff]  ;;  %v402_v20 = vld [vmem:[#allocation2 + $0xc1] ss:$2 sm:$0xff] }
  0x37   : > { %389 = vst.msk [vmem:[#allocation3] sm:$0xff] %vm259_vm0, %v385_v12  ;;  %v378_v22 = vld [vmem:[#allocation2 + $0xc0] ss:$2 sm:$0xff]  ;;  %1293 = vmatpush3.bf16.msra.mxu0 %v1368_v14  ;;  %1309 = vmatpush3.bf16.msra.mxu1 %v1368_v14  ;;  %v380_v24 = vld [vmem:[#allocation2 + $0xf0] ss:$2 sm:$0xff]  ;;  %v695_v27 = vpack.c.bf16 %v682_v19, %v680_v18  ;;  %v411_v28 = vpack.c.bf16 %v404_v21, %v402_v20 }
  0x38   : > { %390 = vst.msk [vmem:[#allocation3 + $0x8] sm:$0xff] %vm259_vm0, %v386_v15  ;;  %v684_v23 = vld [vmem:[#allocation2 + $0x92] ss:$2 sm:$0xff]  ;;  %v1369_v25 = vld [vmem:[%s1924_s1 + $0x8] sm:$0xff]   ;;  %v387_v29 = vpack.c.bf16 %v380_v24, %v378_v22  ;;  %v408_v34 = vld [vmem:[#allocation2 + $0x151] ss:$2 sm:$0xff] }
  0x39   : > { %580 = vrot.lane.b32.xlu0 %v572_v59, %s1472_s14  ;;  %582 = vrot.lane.b32.xlu1 %v573_v60, %s1472_s14  ;;  %v382_v26 = vld [vmem:[#allocation2 + $0x120] ss:$2 sm:$0xff]  ;;  %v384_v30 = vld [vmem:[#allocation2 + $0x150] ss:$2 sm:$0xff]  ;;  %v406_v33 = vld [vmem:[#allocation2 + $0x121] ss:$2 sm:$0xff] }
  0x3a   : > { %v1370_v31 = vld [vmem:[%s1924_s1 + $0x10] ss:$0 sps:$4 sm:$0x33]   ;;  %1294 = vmatprep.subr.bf16.mxu0 %v1369_v25  ;;  %v388_v35 = vpack.c.bf16 %v384_v30, %v382_v26  ;;  %1307 = vmatprep.subr.bf16.mxu1 %v1369_v25  ;;  %391 = vst.msk [vmem:[#allocation3 + $0x10] sm:$0xff] %vm259_vm0, %v387_v29  ;;  %v412_v38 = vpack.c.bf16 %v408_v34, %v406_v33  ;;  %v445_v40 = vld [vmem:[#allocation2 + $0xf2] ss:$2 sm:$0xff] }
  0x3b   : > { %v686_v32 = vld [vmem:[#allocation2 + $0xc2] ss:$2 sm:$0xff]  ;;  %1295 = vmatpush3.bf16.msra.mxu0 %v1369_v25  ;;  %1310 = vmatpush3.bf16.msra.mxu1 %v1369_v25  ;;  %v759_v36 = vsel %vm757_vm3, %v1370_v31, 0  ;;  %v449_v42 = vld [vmem:[#allocation2 + $0x152] ss:$2 sm:$0xff] }
  0x3c   : > { %392 = vst.msk [vmem:[#allocation3 + $0x18] sm:$0xff] %vm259_vm0, %v388_v35  ;;  %1312 = vmatprep.subr.msk.bf16.mxu0 %vm757_vm3, %v1370_v31  ;;  %1313 = vmatprep.subr.msk.bf16.mxu1 %vm757_vm3, %v1370_v31  ;;  %v696_v37 = vpack.c.bf16 %v686_v32, %v684_v23  ;;  %v443_v39 = vld [vmem:[#allocation2 + $0xc2] ss:$2 sm:$0xff]  ;;  %v524_v51 = vld [vmem:[#allocation2 + $0xd9] ss:$2 sm:$0xff]  ;;  %vm889_vm0 = vcmask 57344  }
  0x3d   : > { %621 = vrot.lane.b32.xlu0 %v613_v6, %s1473_s17  ;;  %623 = vrot.lane.b32.xlu1 %v614_v7, %s1473_s17  ;;  %v447_v41 = vld [vmem:[#allocation2 + $0x122] ss:$2 sm:$0xff]  ;;  %v452_v43 = vpack.c.bf16 %v445_v40, %v443_v39  ;;  %v526_v52 = vld [vmem:[#allocation2 + $0x109] ss:$2 sm:$0xff]  ;;  %v528_v53 = vld [vmem:[#allocation2 + $0x139] ss:$2 sm:$0xff] }
  0x3e   : > { %v453_v44 = vpack.c.bf16 %v449_v42, %v447_v41  ;;  %v483_v45 = vld [vmem:[#allocation2 + $0xd8] ss:$2 sm:$0xff]  ;;  %v485_v46 = vld [vmem:[#allocation2 + $0x108] ss:$2 sm:$0xff]  ;;  %v530_v54 = vld [vmem:[#allocation2 + $0x169] ss:$2 sm:$0xff]  ;;  %v533_v55 = vpack.c.bf16 %v526_v52, %v524_v51 }
  0x3f   : > { %1297 = vmatpush3.bf16.msra.mxu0 %v759_v36  ;;  %1311 = vmatpush3.bf16.msra.mxu1 %v759_v36  ;;  %v487_v47 = vld [vmem:[#allocation2 + $0x138] ss:$2 sm:$0xff]  ;;  %v489_v48 = vld [vmem:[#allocation2 + $0x168] ss:$2 sm:$0xff]  ;;  %v492_v49 = vpack.c.bf16 %v485_v46, %v483_v45  ;;  %v534_v56 = vpack.c.bf16 %v530_v54, %v528_v53  ;;  %v647_v5 = vld [vmem:[#allocation2 + $0xf1] ss:$2 sm:$0xff] }
  0x40   : > { %v493_v50 = vpack.c.bf16 %v489_v48, %v487_v47  ;;  %v565_v57 = vld [vmem:[#allocation2 + $0xda] ss:$2 sm:$0xff]  ;;  %v567_v58 = vld [vmem:[#allocation2 + $0x10a] ss:$2 sm:$0xff]  ;;  %v649_v6 = vld [vmem:[#allocation2 + $0x121] ss:$2 sm:$0xff] }
  0x41   : > { %662 = vrot.lane.b32.xlu0 %v654_v16, %s1474_s26  ;;  %664 = vrot.lane.b32.xlu1 %v655_v17, %s1474_s26  ;;  %v569_v59 = vld [vmem:[#allocation2 + $0x13a] ss:$2 sm:$0xff]  ;;  %v571_v60 = vld [vmem:[#allocation2 + $0x16a] ss:$2 sm:$0xff]  ;;  %v574_v61 = vpack.c.bf16 %v567_v58, %v565_v57  ;;  %v651_v7 = vld [vmem:[#allocation2 + $0x151] ss:$2 sm:$0xff]  ;;  %v656_v9 = vpack.c.bf16 %v649_v6, %v647_v5 }
  0x42   : > { %v575_v62 = vpack.c.bf16 %v571_v60, %v569_v59  ;;  %v606_v63 = vld [vmem:[#allocation2 + $0xf0] ss:$2 sm:$0xff]  ;;  %v608_v0 = vld [vmem:[#allocation2 + $0x120] ss:$2 sm:$0xff]  ;;  %v653_v8 = vld [vmem:[#allocation2 + $0x181] ss:$2 sm:$0xff] }
  0x43   : > { %v610_v1 = vld [vmem:[#allocation2 + $0x150] ss:$2 sm:$0xff]  ;;  %v612_v2 = vld [vmem:[#allocation2 + $0x180] ss:$2 sm:$0xff]  ;;  %v615_v3 = vpack.c.bf16 %v608_v0, %v606_v63  ;;  %v657_v10 = vpack.c.bf16 %v653_v8, %v651_v7 }
  0x44   : > { %v616_v4 = vpack.c.bf16 %v612_v2, %v610_v1  ;;  %v688_v11 = vld [vmem:[#allocation2 + $0xf2] ss:$2 sm:$0xff]  ;;  %v690_v12 = vld [vmem:[#allocation2 + $0x122] ss:$2 sm:$0xff] }
  0x45   : > { %703 = vrot.lane.b32.xlu0 %v695_v27, %s1475_s8  ;;  %421 = vrot.lane.b32.xlu1 %v411_v28, %s1468_s10  ;;  %v692_v13 = vld [vmem:[#allocation2 + $0x152] ss:$2 sm:$0xff]  ;;  %v694_v14 = vld [vmem:[#allocation2 + $0x182] ss:$2 sm:$0xff]  ;;  %v697_v15 = vpack.c.bf16 %v690_v12, %v688_v11 }
  0x46   : > { %v698_v16 = vpack.c.bf16 %v694_v14, %v692_v13 }
  0x49   : > { %705 = vrot.lane.b32.xlu0 %v696_v37, %s1475_s8  ;;  %423 = vrot.lane.b32.xlu1 %v412_v38, %s1468_s10  ;;  %s1477_s10 = smov [#allocation4]  }
  0x4d   : > { %462 = vrot.lane.b32.xlu0 %v452_v43, %s1469_s11  ;;  %464 = vrot.lane.b32.xlu1 %v453_v44, %s1469_s11  ;;  %s1375_s11 = sshll.u32 %s1477_s10, 4  ;;  %s1376_s11 = int_to_ptr.vmem [resolvable:$false] %s1375_s11 }
  0x51   : > { %502 = vrot.lane.b32.xlu0 %v492_v49, %s1470_s12  ;;  %504 = vrot.lane.b32.xlu1 %v493_v50, %s1470_s12  ;;  %s1740_s12 = scalar_lea.vmem %s1925_s2, %s1275_s9 }
  0x55   : > { %543 = vrot.lane.b32.xlu0 %v533_v55, %s1471_s13  ;;  %545 = vrot.lane.b32.xlu1 %v534_v56, %s1471_s13  ;;  %s1476_s13 = smov 120  }
  0x59   : > { %584 = vrot.lane.b32.xlu0 %v574_v61, %s1472_s14  ;;  %586 = vrot.lane.b32.xlu1 %v575_v62, %s1472_s14  ;;  %s1803_s14 = sand.u32 1, %s1457_s19  }
  0x5a   : > { %s1245_s15 = sshll.u32 %s1803_s14, 1  ;;  %s1012_s7 = scalar_lea.sflag [#allocation5], %s1803_s14 }
  0x5d   : > { %625 = vrot.lane.b32.xlu0 %v615_v3, %s1473_s17  ;;  %627 = vrot.lane.b32.xlu1 %v616_v4, %s1473_s17  ;;  %s228_s17 = scalar_lea.vmem [#allocation4], %s1245_s15 }
  0x5e   : > { %s1038_s23 = sshll.u32 %s228_s17, 4  ;;  %s1817_s23 = int_to_ptr.vmem [resolvable:$true] %s1038_s23 }
  0x5f   : > { %p1378_p0 = scmp.lt.s32.totalorder %s1817_s23, %s1376_s11 }
  0x61   : > { %666 = vrot.lane.b32.xlu0 %v656_v9, %s1474_s26  ;;  %668 = vrot.lane.b32.xlu1 %v657_v10, %s1474_s26 }
  0x65   : > { %707 = vrot.lane.b32.xlu0 %v697_v15, %s1475_s8  ;;  %709 = vrot.lane.b32.xlu1 %v698_v16, %s1475_s8  ;;  %s1371_s8 = scalar_lea.vmem %s1817_s23, 32 }
  0x66   : > { %p1372_p11 = scmp.ne.s32.totalorder %s1817_s23, %s1371_s8 }
  0x68   : > { %p1373_p12 = pnand %p1372_p11, %p1547_p5 }
  0x6a   : > { %p1374_p13 = pneg %p1373_p12 }
  0x9b   : > { %v418_v17 = vpop.permute.xlu0 %417  ;;  %v459_v18 = vpop.permute.xlu1 %458 }
  0x9c   : > { %430 = vst.msk [vmem:[#allocation3] sm:$0xff] %vm429_vm4, %v418_v17 }
  0x9d   : > { %471 = vst.msk [vmem:[#allocation3] sm:$0xff] %vm470_vm5, %v459_v18 }
  0x9f   : > { %v420_v19 = vpop.permute.xlu0 %419  ;;  %v461_v20 = vpop.permute.xlu1 %460 }
  0xa0   : > { %431 = vst.msk [vmem:[#allocation3 + $0x8] sm:$0xff] %vm429_vm4, %v420_v19 }
  0xa1   : > { %472 = vst.msk [vmem:[#allocation3 + $0x8] sm:$0xff] %vm470_vm5, %v461_v20 }
  0xa3   : > { %v499_v21 = vpop.permute.xlu0 %498  ;;  %v501_v22 = vpop.permute.xlu1 %500 }
  0xa4   : > { %511 = vst.msk [vmem:[#allocation3] sm:$0xff] %vm510_vm6, %v499_v21  ;;  %512 = vst.msk [vmem:[#allocation3 + $0x8] sm:$0xff] %vm510_vm6, %v501_v22 }
  0xa7   : > { %v540_v23 = vpop.permute.xlu0 %539  ;;  %v542_v24 = vpop.permute.xlu1 %541 }
  0xa8   : > { %552 = vst.msk [vmem:[#allocation3] sm:$0xff] %vm551_vm7, %v540_v23  ;;  %553 = vst.msk [vmem:[#allocation3 + $0x8] sm:$0xff] %vm551_vm7, %v542_v24 }
  0xab   : > { %v581_v25 = vpop.permute.xlu0 %580  ;;  %v583_v26 = vpop.permute.xlu1 %582 }
  0xac   : > { %593 = vst.msk [vmem:[#allocation3] sm:$0xff] %vm592_vm8, %v581_v25  ;;  %594 = vst.msk [vmem:[#allocation3 + $0x8] sm:$0xff] %vm592_vm8, %v583_v26 }
  0xaf   : > { %v622_v27 = vpop.permute.xlu0 %621  ;;  %v624_v28 = vpop.permute.xlu1 %623 }
  0xb0   : > { %634 = vst.msk [vmem:[#allocation3] sm:$0xff] %vm633_vm9, %v622_v27  ;;  %635 = vst.msk [vmem:[#allocation3 + $0x8] sm:$0xff] %vm633_vm9, %v624_v28 }
  0xb3   : > { %v663_v29 = vpop.permute.xlu0 %662  ;;  %v665_v30 = vpop.permute.xlu1 %664 }
  0xb4   : > { %675 = vst.msk [vmem:[#allocation3] sm:$0xff] %vm674_vm10, %v663_v29  ;;  %676 = vst.msk [vmem:[#allocation3 + $0x8] sm:$0xff] %vm674_vm10, %v665_v30 }
  0xb7   : > { %v704_v31 = vpop.permute.xlu0 %703  ;;  %v422_v32 = vpop.permute.xlu1 %421 }
  0xb8   : > { %716 = vst.msk [vmem:[#allocation3] sm:$0xff] %vm715_vm11, %v704_v31 }
  0xb9   : > { %432 = vst.msk [vmem:[#allocation3 + $0x10] sm:$0xff] %vm429_vm4, %v422_v32 }
  0xbb   : > { %v706_v33 = vpop.permute.xlu0 %705  ;;  %v424_v34 = vpop.permute.xlu1 %423 }
  0xbc   : > { %717 = vst.msk [vmem:[#allocation3 + $0x8] sm:$0xff] %vm715_vm11, %v706_v33 }
  0xbd   : > { %433 = vst.msk [vmem:[#allocation3 + $0x18] sm:$0xff] %vm429_vm4, %v424_v34 }
  0xbf   : > { %v463_v35 = vpop.permute.xlu0 %462  ;;  %v465_v36 = vpop.permute.xlu1 %464  ;;  %v720_v37 = vld [vmem:[#allocation3] sm:$0xff] }
  0xc0   : > { %473 = vst.msk [vmem:[#allocation3 + $0x10] sm:$0xff] %vm470_vm5, %v463_v35  ;;  %474 = vst.msk [vmem:[#allocation3 + $0x18] sm:$0xff] %vm470_vm5, %v465_v36  ;;  %1298 = vmatprep.mubr.msk.bf16.mxu0 %vm744_vm12, %v720_v37 }
  0xc3   : > { %v503_v38 = vpop.permute.xlu0 %502  ;;  %v505_v39 = vpop.permute.xlu1 %504  ;;  %v721_v40 = vld [vmem:[#allocation3 + $0x8] sm:$0xff] }
  0xc4   : > { %513 = vst.msk [vmem:[#allocation3 + $0x10] sm:$0xff] %vm510_vm6, %v503_v38  ;;  %514 = vst.msk [vmem:[#allocation3 + $0x18] sm:$0xff] %vm510_vm6, %v505_v39  ;;  %1299 = vmatmul.mubr.msk.bf16.vlgmr.msra.gmra.mrb[0].mxu0 %vm744_vm12, %v721_v40 }
  0xc7   : > { %v544_v41 = vpop.permute.xlu0 %543  ;;  %v546_v42 = vpop.permute.xlu1 %545 }
  0xc8   : > { %554 = vst.msk [vmem:[#allocation3 + $0x10] sm:$0xff] %vm551_vm7, %v544_v41  ;;  %555 = vst.msk [vmem:[#allocation3 + $0x18] sm:$0xff] %vm551_vm7, %v546_v42 }
  0xcb   : > { %v585_v43 = vpop.permute.xlu0 %584  ;;  %v587_v44 = vpop.permute.xlu1 %586 }
  0xcc   : > { %595 = vst.msk [vmem:[#allocation3 + $0x10] sm:$0xff] %vm592_vm8, %v585_v43  ;;  %596 = vst.msk [vmem:[#allocation3 + $0x18] sm:$0xff] %vm592_vm8, %v587_v44 }
  0xcf   : > { %v626_v45 = vpop.permute.xlu0 %625  ;;  %v628_v46 = vpop.permute.xlu1 %627 }
  0xd0   : > { %636 = vst.msk [vmem:[#allocation3 + $0x10] sm:$0xff] %vm633_vm9, %v626_v45  ;;  %637 = vst.msk [vmem:[#allocation3 + $0x18] sm:$0xff] %vm633_vm9, %v628_v46 }
  0xd3   : > { %v667_v47 = vpop.permute.xlu0 %666  ;;  %v669_v48 = vpop.permute.xlu1 %668 }
  0xd4   : > { %677 = vst.msk [vmem:[#allocation3 + $0x10] sm:$0xff] %vm674_vm10, %v667_v47  ;;  %678 = vst.msk [vmem:[#allocation3 + $0x18] sm:$0xff] %vm674_vm10, %v669_v48 }
  0xd7   : > { %v708_v49 = vpop.permute.xlu0 %707  ;;  %v710_v50 = vpop.permute.xlu1 %709 }
  0xd8   : > { %718 = vst.msk [vmem:[#allocation3 + $0x10] sm:$0xff] %vm715_vm11, %v708_v49  ;;  %719 = vst.msk [vmem:[#allocation3 + $0x18] sm:$0xff] %vm715_vm11, %v710_v50 }
  0xdf   : > { %v722_v51 = vld [vmem:[#allocation3 + $0x10] sm:$0xff]  ;;  %v723_v52 = vld [vmem:[#allocation3 + $0x18] sm:$0xff] }
  0xe0   : > { %1302 = vmatprep.mubr.msk.bf16.mxu1 %vm744_vm12, %v722_v51 }
  0xe1   : > { %1303 = vmatmul.mubr.msk.bf16.vlgmr.msra.gmra.mrb[0].mxu1 %vm744_vm12, %v723_v52 }
 0x197   : > { %v1300_v53 = vpop.f32.mrb[0].mxu0 }
 0x198   : > { %v795_v54 = vpop.f32.mrb[1].mxu0  ;;  %v1279_v55 = vpack.c.bf16 %v1300_v53, %v1300_v53  ;;  %v871_v59 = vsel %vm867_vm13, %v1300_v53, 0.0  ;;  %v893_v60 = vmul.f32 %v1300_v53, %v1300_v53  ;;  %v957_v61 = vsel %vm953_vm14, %v1300_v53, 0.0 }
 0x199   : > { %v891_v56 = vmul.f32 %v795_v54, %v795_v54  ;;  %v1301_v57 = vpop.f32.mrb[2].mxu0  ;;  %v1277_v58 = vpack.c.bf16 %v795_v54, %v795_v54  ;;  %v868_v0 = vsel %vm867_vm13, %v795_v54, 0.0  ;;  %v954_v6 = vsel %vm953_vm14, %v795_v54, 0.0 }
 0x19a   : > { %925 = vrot.lane.b32.xlu0 %v1279_v55, %s1476_s13  ;;  %861 = vst.msk [vmem:[%s1740_s12 + $0x8] sm:$0xf] %vm858_vm15, %v1279_v55  ;;  %v798_v62 = vpop.f32.mrb[3].mxu0  ;;  %v894_v3 = vmul.f32 %v1301_v57, %v1301_v57  ;;  %v902_v15 = vsel %vm867_vm13, %v893_v60, 0.0  ;;  %v983_v16 = vsel %vm953_vm14, %v893_v60, 0.0  ;;  %v873_v17 = vsel %vm867_vm13, %v1301_v57, 0.0 }
 0x19b   : > { %v1278_v63 = vpack.c.bf16 %v798_v62, %v798_v62  ;;  %v869_v1 = vsel %vm867_vm13, %v798_v62, 0.0  ;;  %v892_v2 = vmul.f32 %v798_v62, %v798_v62  ;;  %859 = vst.msk [vmem:[%s1740_s12] sm:$0xf] %vm858_vm15, %v1277_v58  ;;  %v899_v5 = vsel %vm867_vm13, %v891_v56, 0.0 }
 0x19c   : > { %v870_v4 = vadd.f32 %v869_v1, %v868_v0  ;;  %v955_v8 = vsel %vm953_vm14, %v798_v62, 0.0  ;;  %v980_v9 = vsel %vm953_vm14, %v891_v56, 0.0  ;;  %v1280_v18 = vpack.c.bf16 %v1301_v57, %v1301_v57 }
 0x19d   : > { %860 = vst.msk [vmem:[%s1740_s12 + $0x4] sm:$0xf] %vm858_vm15, %v1278_v63  ;;  %v900_v7 = vsel %vm867_vm13, %v892_v2, 0.0  ;;  %v981_v10 = vsel %vm953_vm14, %v892_v2, 0.0  ;;  %v956_v13 = vadd.f32 %v955_v8, %v954_v6  ;;  %v904_v23 = vsel %vm867_vm13, %v894_v3, 0.0 }
 0x19e   : > { %v872_v11 = vadd.f32 %v871_v59, %v870_v4  ;;  %v901_v12 = vadd.f32 %v900_v7, %v899_v5  ;;  %v982_v14 = vadd.f32 %v981_v10, %v980_v9  ;;  %921 = vrot.lane.b32.xlu0 %v1277_v58, %s1476_s13  ;;  %v959_v24 = vsel %vm953_vm14, %v1301_v57, 0.0  ;;  %927 = vrot.lane.b32.xlu1 %v1280_v18, %s1476_s13 }
 0x19f   : > { %v958_v20 = vadd.f32 %v957_v61, %v956_v13  ;;  %v985_v25 = vsel %vm953_vm14, %v894_v3, 0.0  ;;  %862 = vst.msk [vmem:[%s1740_s12 + $0xc] sm:$0xf] %vm858_vm15, %v1280_v18 }
 0x1a0   : > { %v903_v19 = vadd.f32 %v902_v15, %v901_v12  ;;  %v984_v21 = vadd.f32 %v983_v16, %v982_v14  ;;  %v874_v22 = vadd.f32 %v873_v17, %v872_v11 }
 0x1a1   : > { %v960_v27 = vadd.f32 %v959_v24, %v958_v20 }
 0x1a2   : > { %v905_v26 = vadd.f32 %v904_v23, %v903_v19  ;;  %v986_v28 = vadd.f32 %v985_v25, %v984_v21  ;;  %923 = vrot.lane.b32.xlu1 %v1278_v63, %s1476_s13 }
 0x1b4   : > { %v1304_v29 = vpop.f32.mrb[0].mxu1 }
 0x1b5   : > { %v811_v30 = vpop.f32.mrb[1].mxu1  ;;  %v1770_v31 = vpack.c.bf16 %v1304_v29, %v1304_v29  ;;  %v897_v41 = vmul.f32 %v1304_v29, %v1304_v29  ;;  %v879_v48 = vsel %vm867_vm13, %v1304_v29, 0.0  ;;  %v965_v56 = vsel %vm953_vm14, %v1304_v29, 0.0 }
 0x1b6   : > { %v875_v32 = vsel %vm867_vm13, %v811_v30, 0.0  ;;  %v895_v33 = vmul.f32 %v811_v30, %v811_v30  ;;  %v1305_v34 = vpop.f32.mrb[2].mxu1  ;;  %v1281_v35 = vpack.c.bf16 %v811_v30, %v811_v30  ;;  %v961_v36 = vsel %vm953_vm14, %v811_v30, 0.0 }
 0x1b7   : > { %v814_v37 = vpop.f32.mrb[3].mxu1  ;;  %865 = vst.msk [vmem:[%s1740_s12 + $0x18] sm:$0xf] %vm858_vm15, %v1770_v31  ;;  %v876_v42 = vadd.f32 %v875_v32, %v874_v22  ;;  %v962_v46 = vadd.f32 %v961_v36, %v960_v27  ;;  %v1788_v51 = vpack.c.bf16 %v1305_v34, %v1305_v34  ;;  %v898_v52 = vmul.f32 %v1305_v34, %v1305_v34 }
 0x1b8   : > { %v906_v38 = vsel %vm867_vm13, %v895_v33, 0.0  ;;  %v987_v39 = vsel %vm953_vm14, %v895_v33, 0.0  ;;  %v1282_v40 = vpack.c.bf16 %v814_v37, %v814_v37  ;;  %929 = vrot.lane.b32.xlu0 %v1281_v35, %s1476_s13  ;;  %863 = vst.msk [vmem:[%s1740_s12 + $0x10] sm:$0xf] %vm858_vm15, %v1281_v35  ;;  %v877_v43 = vsel %vm867_vm13, %v814_v37, 0.0 }
 0x1b9   : > { %v896_v44 = vmul.f32 %v814_v37, %v814_v37  ;;  %v907_v45 = vadd.f32 %v906_v38, %v905_v26  ;;  %v963_v47 = vsel %vm953_vm14, %v814_v37, 0.0  ;;  %v878_v49 = vadd.f32 %v877_v43, %v876_v42  ;;  %866 = vst.msk [vmem:[%s1740_s12 + $0x1c] sm:$0xf] %vm858_vm15, %v1788_v51 }
 0x1ba   : > { %864 = vst.msk [vmem:[%s1740_s12 + $0x14] sm:$0xf] %vm858_vm15, %v1282_v40  ;;  %931 = vrot.lane.b32.xlu1 %v1282_v40, %s1476_s13  ;;  %v988_v50 = vadd.f32 %v987_v39, %v986_v28  ;;  %v964_v54 = vadd.f32 %v963_v47, %v962_v46  ;;  %v910_v60 = vsel %vm867_vm13, %v897_v41, 0.0  ;;  %v991_v61 = vsel %vm953_vm14, %v897_v41, 0.0  ;;  %s1377_s12 = scalar_lea.vmem %s1376_s11, 64 }
 0x1bb   : > { %v908_v53 = vsel %vm867_vm13, %v896_v44, 0.0  ;;  %v989_v55 = vsel %vm953_vm14, %v896_v44, 0.0  ;;  %v880_v57 = vadd.f32 %v879_v48, %v878_v49  ;;  %v881_v62 = vsel %vm867_vm13, %v1305_v34, 0.0  ;;  %p1379_p1 = scmp.lt.s32.totalorder %s1377_s12, %s1371_s8 }
 0x1bc   : > { %v909_v58 = vadd.f32 %v908_v53, %v907_v45  ;;  %v990_v59 = vadd.f32 %v989_v55, %v988_v50  ;;  %v966_v63 = vadd.f32 %v965_v56, %v964_v54  ;;  %v967_v0 = vsel %vm953_vm14, %v1305_v34, 0.0 }
 0x1bd   : > { %v882_v1 = vadd.f32 %v881_v62, %v880_v57  ;;  %v912_v4 = vsel %vm867_vm13, %v898_v52, 0.0  ;;  %v993_v5 = vsel %vm953_vm14, %v898_v52, 0.0  ;;  %p1380_p2 = por %p1379_p1, %p1378_p0 }
 0x1be   : > { %v911_v2 = vadd.f32 %v910_v60, %v909_v58  ;;  %v992_v3 = vadd.f32 %v991_v61, %v990_v59  ;;  %v968_v6 = vadd.f32 %v967_v0, %v966_v63 }
 0x1bf   : > { %v883_v7 = vrot.slane %v882_v1, 4  ;;  %p1381_p3 = pnand %p1380_p2, %p1374_p13 }
 0x1c0   : > { %v913_v8 = vadd.f32 %v912_v4, %v911_v2  ;;  %v994_v9 = vadd.f32 %v993_v5, %v992_v3  ;;  %v969_v10 = vrot.slane %v968_v6, 4 }
 0x1c1   : > { %v884_v11 = vadd.f32 %v883_v7, %v882_v1 }
 0x1c2   : > { %v914_v12 = vrot.slane %v913_v8, 4  ;;  %v995_v13 = vrot.slane %v994_v9, 4  ;;  %v970_v14 = vadd.f32 %v969_v10, %v968_v6 }
 0x1c3   : > { %v885_v15 = vrot.slane %v884_v11, 2 }
 0x1c4   : > { %v915_v16 = vadd.f32 %v914_v12, %v913_v8  ;;  %v996_v17 = vadd.f32 %v995_v13, %v994_v9  ;;  %v971_v18 = vrot.slane %v970_v14, 2 }
 0x1c5   : > { %v886_v20 = vadd.f32 %v885_v15, %v884_v11 }
 0x1c6   : > { %v997_v19 = vrot.slane %v996_v17, 2  ;;  %v916_v21 = vrot.slane %v915_v16, 2  ;;  %v972_v22 = vadd.f32 %v971_v18, %v970_v14 }
 0x1c7   : > { %v887_v24 = vrot.slane %v886_v20, 1 }
 0x1c8   : > { %v998_v23 = vadd.f32 %v997_v19, %v996_v17  ;;  %v917_v25 = vadd.f32 %v916_v21, %v915_v16  ;;  %v973_v26 = vrot.slane %v972_v22, 1 }
 0x1c9   : > { %v888_v28 = vadd.f32 %v887_v24, %v886_v20 }
 0x1ca   : > { %v999_v27 = vrot.slane %v998_v23, 1  ;;  %v918_v29 = vrot.slane %v917_v25, 1  ;;  %v974_v30 = vadd.f32 %v973_v26, %v972_v22 }
 0x1cb   : > { %890 = vst.msk [vmem:[%s228_s17] sm:$0x1] %vm889_vm0, %v888_v28 }
 0x1cc   : > { %v1000_v32 = vadd.f32 %v999_v27, %v998_v23  ;;  %v919_v33 = vadd.f32 %v918_v29, %v917_v25  ;;  %976 = vrot.lane.b32.xlu0 %v974_v30, %s1476_s13 }
 0x1ce   : > { %1002 = vrot.lane.b32.xlu1 %v1000_v32, %s1476_s13  ;;  %920 = vst.msk [vmem:[%s228_s17 + $0x1] sm:$0x1] %vm889_vm0, %v919_v33 }
 0x1cf   : > { %1384 = shalt.err (!%p1381_p3)
}
 0x1d0   : > { %s1385_s17 = scalar_lea.hbm %s1815_s6, 32  ;;  %s1389_s10 = scalar_lea.hbm %s1926_s3, 64 }
 0x1d1   : > { %p1386_p4 = scmp.ne.s32.totalorder %s1815_s6, %s1385_s17  ;;  %p1390_p9 = scmp.lt.u32.totalorder %s1815_s6, %s1926_s3 }
 0x1d2   : > { %p1391_p10 = scmp.lt.u32.totalorder %s1389_s10, %s1385_s17  ;;  %p1393_p12 = scmp.lt.u32.totalorder %s1385_s17, %s1815_s6 }
 0x1d3   : > { %p1387_p7 = pnand %p1386_p4, %p1547_p5 }
 0x1d4   : > { %p1392_p11 = por %p1391_p10, %p1390_p9 }
 0x1d5   : > { %p1388_p8 = pneg %p1387_p7 }
 0x1d6   : > { %p1394_p13 = por %p1393_p12, %p1392_p11 }
 0x1d8   : > { %p1395_p0 = pnand %p1394_p13, %p1388_p8 }
 0x1da   : > { %1398 = shalt.err (!%p1395_p0)
}
 0x1db   : > { %1314 = dma.vmem_to_hbm [thread:$0]  (%p1547_p5), %s1817_s23, 32, %s1815_s6, %s1012_s7   ;;  %933 = vrot.lane.b32.xlu0 %v1770_v31, %s1476_s13  ;;  %935 = vrot.lane.b32.xlu1 %v1788_v51, %s1476_s13 }
 0x1dc   : > { %s1853_s12 = scalar_lea.vmem %s1927_s4, %s1275_s9  ;;  %s242_s30 = scalar_lea.vmem [#allocation6], %s1245_s15 }
 0x1dd   : > { %s1054_s9 = sshll.u32 %s242_s30, 4  ;;  %s1932_s13 = sshll.u32 %s1530_s22, 5  ;;  %s1876_s9 = int_to_ptr.vmem [resolvable:$true] %s1054_s9 }
 0x1de   : > { %s1874_s7 = scalar_lea.hbm %s1928_s5, %s1932_s13  ;;  %s1022_s17 = scalar_lea.sflag [#allocation7], %s1803_s14 }
 0x1df   : > { %s1399_s15 = scalar_lea.vmem %s1876_s9, 32  ;;  %s1478_s22 = smov [#allocation6]  }
 0x1e0   : > { %p1400_p1 = scmp.ne.s32.totalorder %s1876_s9, %s1399_s15  ;;  %s1403_s25 = sshll.u32 %s1478_s22, 4  ;;  %s1404_s25 = int_to_ptr.vmem [resolvable:$false] %s1403_s25 }
 0x1e1   : > { %s1405_s26 = scalar_lea.vmem %s1404_s25, 64  ;;  %p1406_p4 = scmp.lt.s32.totalorder %s1876_s9, %s1404_s25 }
 0x1e2   : > { %p1401_p2 = pnand %p1400_p1, %p1547_p5  ;;  %p1407_p7 = scmp.lt.s32.totalorder %s1405_s26, %s1399_s15 }
 0x1e4   : > { %p1402_p3 = pneg %p1401_p2  ;;  %p1408_p8 = por %p1407_p7, %p1406_p4 }
 0x1e6   : > { %p1409_p9 = pnand %p1408_p8, %p1402_p3 }
 0x20c   : > { %v926_v34 = vpop.permute.xlu0 %925 }
 0x20d   : > { %947 = vst.msk [vmem:[%s1853_s12 + $0x8] sm:$0xf] %vm858_vm15, %v926_v34 }
 0x210   : > { %v922_v31 = vpop.permute.xlu0 %921  ;;  %v928_v35 = vpop.permute.xlu1 %927 }
 0x211   : > { %945 = vst.msk [vmem:[%s1853_s12] sm:$0xf] %vm858_vm15, %v922_v31  ;;  %948 = vst.msk [vmem:[%s1853_s12 + $0xc] sm:$0xf] %vm858_vm15, %v928_v35 }
 0x214   : > { %v924_v36 = vpop.permute.xlu1 %923 }
 0x215   : > { %946 = vst.msk [vmem:[%s1853_s12 + $0x4] sm:$0xf] %vm858_vm15, %v924_v36 }
 0x22a   : > { %v930_v37 = vpop.permute.xlu0 %929 }
 0x22b   : > { %949 = vst.msk [vmem:[%s1853_s12 + $0x10] sm:$0xf] %vm858_vm15, %v930_v37 }
 0x22c   : > { %v932_v38 = vpop.permute.xlu1 %931 }
 0x22d   : > { %950 = vst.msk [vmem:[%s1853_s12 + $0x14] sm:$0xf] %vm858_vm15, %v932_v38 }
 0x23e   : > { %v977_v39 = vpop.permute.xlu0 %976 }
 0x23f   : > { %979 = vst.msk [vmem:[%s242_s30] sm:$0x1] %vm889_vm0, %v977_v39 }
 0x240   : > { %v1003_v40 = vpop.permute.xlu1 %1002 }
 0x241   : > { %1005 = vst.msk [vmem:[%s242_s30 + $0x1] sm:$0x1] %vm889_vm0, %v1003_v40 }
 0x242   : > { %1412 = shalt.err (!%p1409_p9)
}
 0x243   : > { %s1413_s14 = scalar_lea.hbm %s1874_s7, 32  ;;  %s1417_s16 = scalar_lea.hbm %s1928_s5, 64 }
 0x244   : > { %p1414_p10 = scmp.ne.s32.totalorder %s1874_s7, %s1413_s14  ;;  %p1418_p13 = scmp.lt.u32.totalorder %s1874_s7, %s1928_s5 }
 0x245   : > { %p1419_p0 = scmp.lt.u32.totalorder %s1417_s16, %s1413_s14  ;;  %p1421_p2 = scmp.lt.u32.totalorder %s1413_s14, %s1874_s7 }
 0x246   : > { %p1415_p11 = pnand %p1414_p10, %p1547_p5 }
 0x247   : > { %p1420_p1 = por %p1419_p0, %p1418_p13 }
 0x248   : > { %p1416_p12 = pneg %p1415_p11 }
 0x249   : > { %p1422_p3 = por %p1421_p2, %p1420_p1 }
 0x24b   : > { %p1423_p4 = pnand %p1422_p3, %p1416_p12 }
 0x24d   : > { %1426 = shalt.err (!%p1423_p4)
}
 0x24e   : > { %1315 = dma.vmem_to_hbm [thread:$0]  (%p1547_p5), %s1876_s9, 32, %s1874_s7, %s1022_s17   ;;  %v934_v41 = vpop.permute.xlu0 %933  ;;  %v936_v42 = vpop.permute.xlu1 %935 }
 0x24f   : > { %951 = vst.msk [vmem:[%s1853_s12 + $0x18] sm:$0xf] %vm858_vm15, %v934_v41  ;;  %952 = vst.msk [vmem:[%s1853_s12 + $0x1c] sm:$0xf] %vm858_vm15, %v936_v42 }
 0x250 PF: > { %p1325_p7 = scmp.ge.s32.totalorder %s1465_s21, 2  ;;  %s1074_s13 = sand.u32 1, %s1453_s18  }
 0x251   : > { %s1075_s28 = scalar_lea.sflag [#allocation5], %s1074_s13 }
 0x252   : > { %p1319_p8 = pnand %p1325_p7, %p1551_p6 }
 0x254   : > { %1444 = dma.done.wait (!%p1319_p8), %s1075_s28, 32  }
 0x255   : > { %1446 = vsyncadd (!%p1319_p8), %s1075_s28, 4294967264  ;;  %s1092_s23 = scalar_lea.sflag [#allocation7], %s1074_s13 }
 0x256   : > { %1448 = dma.done.wait (!%p1319_p8), %s1092_s23, 32  }
 0x257   : > { %1450 = vsyncadd (!%p1319_p8), %s1092_s23, 4294967264  ;;  %p19_p5 = scmp.ge.s32.totalorder %s1534_s24, 4   ;;  %s1933_s18 = smov %s1457_s19 }
 0x258   : > { %s1934_s19 = smov %s1461_s20  ;;  %s1935_s20 = smov %s1545_s27 }
 0x259   : > { %s1936_s21 = smov %s1534_s24  ;;  %21 = sbr.rel (!%p19_p5) target bundleno = 5 (0x5), region = 176 }
 0x260   :  { %1097 = vsyncpa [#allocation5], 1 }
 0x261   :  { %1099 = vsyncpa [#allocation5 + $0x1], 1 }
 0x262   :  { %1100 = vsyncpa [#allocation7], 1 }
 0x263   :  { %1102 = vsyncpa [#allocation7 + $0x1], 1 }

</bundles_post_ra>
